<compile_context>
chip_gen: v6e
topology: v6e:2x2x1
jax: 0.10.0
libtpu: 0.0.40
codegen_flags: <defaults>
</compile_context>

<pallas_src>
import jax
import jax.numpy as jnp
from jax import lax
from jax.experimental import pallas as pl
from jax.experimental.pallas import tpu as pltpu


def _silu(x):
    return x * jax.nn.sigmoid(x)


# ----------------------------- kernel -----------------------------

def make_egnn_kernel(nr_layers: int):
    """Inputs: dst_idx [Ep,1], src_idx [Ep,1], x [N,P] f32, h [N,HP] f32,
               wl [L,6,HP,HP] bf16, bl [L,5,HP] f32,
               wf [3,HP,HP] bf16, bf [3,HP] f32,
               w_out [HP,Cpad] bf16, b_out [1,Cpad] f32."""

    def kernel(dst_ref, src_ref, x_ref, h_ref, wl_ref, bl_ref,
               wf_ref, bf_ref, wout_ref, bout_ref, out_ref):
        f32, bf16 = jnp.float32, jnp.bfloat16

        dst_idx = dst_ref[...]                       # [Ep, 1] int32 (targets i)
        src_idx = src_ref[...]                       # [Ep, 1] int32 (sources j)
        x = x_ref[...]                               # [N, P] f32
        h = h_ref[...]                               # [N, HP] f32

        ep = dst_idx.shape[0]
        n = x.shape[0]

        iota_e = lax.broadcasted_iota(jnp.int32, (ep, n), 1)
        dst_hit = dst_idx == iota_e                  # bool [Ep, N]
        src_hit = src_idx == iota_e

        # One-time squared distance per edge (f32 gather for full precision).
        dsub = dst_hit.astype(f32) - src_hit.astype(f32)
        diff = jnp.dot(dsub, x, preferred_element_type=f32)         # [Ep, P]
        dist = jnp.sum(diff * diff, axis=1, keepdims=True)          # [Ep, 1]

        # bf16 one-hots for the MXU layer loop (0/1 exactly representable).
        dst_oh = dst_hit.astype(bf16)                # [Ep, N]
        src_oh = src_hit.astype(bf16)

        for l in range(nr_layers):
            h_bf = h.astype(bf16)

            # EdgeMLP layer-1 hoisted to node space, then gathered per edge.
            p_i = jnp.dot(h_bf, wl_ref[l, 0], preferred_element_type=f32).astype(bf16)
            p_j = jnp.dot(h_bf, wl_ref[l, 1], preferred_element_type=f32).astype(bf16)
            m = _silu(jnp.dot(dst_oh, p_i, preferred_element_type=f32)
                      + jnp.dot(src_oh, p_j, preferred_element_type=f32)
                      + dist * bl_ref[l, 0:1] + bl_ref[l, 1:2])
            m = _silu(jnp.dot(m.astype(bf16), wl_ref[l, 2], preferred_element_type=f32)
                      + bl_ref[l, 2:3])

            # aggregate (aggr='add'): transpose-free scatter-add on the MXU.
            aggr = lax.dot_general(
                dst_oh, m.astype(bf16),
                dimension_numbers=(((0,), (0,)), ((), ())),
                preferred_element_type=f32)                           # [N, HP]

            # update(): NodeMLP with row-split first layer (no concat).
            u = _silu(jnp.dot(h_bf, wl_ref[l, 3], preferred_element_type=f32)
                      + jnp.dot(aggr.astype(bf16), wl_ref[l, 4], preferred_element_type=f32)
                      + bl_ref[l, 3:4])
            h = jnp.dot(u.astype(bf16), wl_ref[l, 5], preferred_element_type=f32) + bl_ref[l, 4:5]

        # final_mlp1, then global_add_pool (batch=None -> sum over all nodes).
        h_bf = h.astype(bf16)
        g = _silu(jnp.dot(h_bf, wf_ref[0], preferred_element_type=f32) + bf_ref[0:1])
        g = jnp.dot(g.astype(bf16), wf_ref[1], preferred_element_type=f32) + bf_ref[1:2]
        pooled = jnp.sum(g, axis=0, keepdims=True)                    # [1, HP]

        # final_mlp2 (last layer padded to lane-dense output width).
        o = _silu(jnp.dot(pooled.astype(bf16), wf_ref[2], preferred_element_type=f32)
                  + bf_ref[2:3])
        out_ref[...] = (jnp.dot(o.astype(bf16), wout_ref[...], preferred_element_type=f32)
                        + bout_ref[...])                               # [1, Cpad]

    return kernel


# ----------------------------- wrapper -----------------------------

def pack_params(flat_params, gconv_in_dim, hidden_dim, nr_layers, nr_classes,
                hp, out_pad):
    """Repack per-layer params into 6 dense arrays, splitting concat-facing
    weights row-wise and zero-padding everything to the lane-dense HP width.
    Matmul weights are cast to bf16; biases / the dist row stay f32."""
    H = hidden_dim

    def pad_mat(w):
        return jnp.zeros((hp, hp), jnp.float32).at[:w.shape[0], :w.shape[1]].set(w)

    def pad_vec(v):
        return jnp.zeros((hp,), jnp.float32).at[:v.shape[0]].set(v)

    w_layers, b_layers = [], []
    idx = 0
    for layer in range(nr_layers):
        fin = gconv_in_dim if layer == 0 else H
        We1, be1, We2, be2, Wn1, bn1, Wn2, bn2 = flat_params[idx:idx + 8]
        idx += 8
        we1_i = pad_mat(We1[:fin])             # acts on h_i
        we1_j = pad_mat(We1[fin:2 * fin])      # acts on h_j
        we1_d = pad_vec(We1[2 * fin])          # acts on dist (elementwise, f32)
        wn1_h = pad_mat(Wn1[:fin])             # acts on h
        wn1_a = pad_mat(Wn1[fin:fin + H])      # acts on aggr
        w_layers.append(jnp.stack([we1_i, we1_j, pad_mat(We2), wn1_h, wn1_a, pad_mat(Wn2)]))
        b_layers.append(jnp.stack([we1_d, pad_vec(be1[0]), pad_vec(be2[0]),
                                   pad_vec(bn1[0]), pad_vec(bn2[0])]))
    w_layers = jnp.stack(w_layers).astype(jnp.bfloat16)   # [L, 6, HP, HP] bf16
    b_layers = jnp.stack(b_layers)                        # [L, 5, HP] f32

    Wf1a, bf1a, Wf1b, bf1b, Wf2a, bf2a, Wf2b, bf2b = flat_params[idx:idx + 8]
    w_final = jnp.stack([pad_mat(Wf1a), pad_mat(Wf1b), pad_mat(Wf2a)]).astype(jnp.bfloat16)
    b_final = jnp.stack([pad_vec(bf1a[0]), pad_vec(bf1b[0]), pad_vec(bf2a[0])])
    w_out = (jnp.zeros((hp, out_pad), jnp.float32)
             .at[:H, :nr_classes].set(Wf2b)).astype(jnp.bfloat16)
    b_out = jnp.zeros((1, out_pad), jnp.float32).at[:, :nr_classes].set(bf2b)
    return w_layers, b_layers, w_final, b_final, w_out, b_out


def _vmem_limit_bytes(n, ep, p, hp, nr_layers, out_pad):
    """Footprint-derived scoped-VMEM budget with ~2x headroom, capped at 48 MiB
    so it stays inside v7x's 64 MiB physical VMEM (plenty on v5e/v6e)."""
    weights = (nr_layers * 6 * hp * hp * 2 + nr_layers * 5 * hp * 4
               + 3 * hp * hp * 2 + 3 * hp * 4 + hp * out_pad * 2 + out_pad * 4)
    node_edge = 2 * ep * 4 + n * p * 4 + n * hp * 4
    onehots = 2 * ep * n * (2 + 4)            # bf16 dst/src + transient f32 diff one-hot
    acts = (3 * ep * hp + 6 * n * hp) * 4
    total = 2 * (weights + node_edge + onehots + acts) + (4 << 20)
    return int(min(max(total, 32 << 20), 48 << 20))


def egnn_forward_pallas(x, h, edge_index, flat_params,
                        gconv_in_dim, hidden_dim, nr_layers, nr_classes):
    N = x.shape[0]
    E = edge_index.shape[1]
    HP = ((max(hidden_dim, 128) + 127) // 128) * 128        # lane-dense hidden width
    out_pad = ((nr_classes + 127) // 128) * 128

    # Pad edge count to a multiple of 16 (bf16 packs 2 rows per sublane).
    # Padded edges use index -1: all-zero one-hot row -> gathers zeros and
    # contributes nothing to the scatter-add (exactly preserving semantics).
    e_pad = ((E + 15) // 16) * 16
    src = edge_index[0].astype(jnp.int32)
    dst = edge_index[1].astype(jnp.int32)
    if e_pad != E:
        fill = -jnp.ones((e_pad - E,), jnp.int32)
        src = jnp.concatenate([src, fill])
        dst = jnp.concatenate([dst, fill])
    dst_idx = dst.reshape(e_pad, 1)
    src_idx = src.reshape(e_pad, 1)

    # Zero-pad node features to HP lanes; matching zero weight rows/cols keep
    # the math exact.
    h_pad = jnp.zeros((N, HP), jnp.float32).at[:, :h.shape[1]].set(h.astype(jnp.float32))

    packed = pack_params(flat_params, gconv_in_dim, hidden_dim, nr_layers,
                         nr_classes, HP, out_pad)

    kernel = make_egnn_kernel(nr_layers)
    n_inputs = 4 + len(packed)    # dst_idx, src_idx, x, h_pad + 6 packed param arrays

    out = pl.pallas_call(
        kernel,
        out_shape=jax.ShapeDtypeStruct((1, out_pad), jnp.float32),
        in_specs=[pl.BlockSpec(memory_space=pltpu.MemorySpace.VMEM)] * n_inputs,
        out_specs=pl.BlockSpec(memory_space=pltpu.MemorySpace.VMEM),
        compiler_params=pltpu.CompilerParams(
            vmem_limit_bytes=_vmem_limit_bytes(N, e_pad, x.shape[1], HP,
                                               nr_layers, out_pad)),
    )(dst_idx, src_idx, x.astype(jnp.float32), h_pad, *packed)

    return out[:, :nr_classes]


# ---------------- parameter construction (deterministic) ----------------

def _init_linear(key, in_dim, out_dim):
    kw, kb = jax.random.split(key)
    bound = 1.0 / jnp.sqrt(in_dim)
    W = jax.random.uniform(kw, (in_dim, out_dim), jnp.float32, -bound, bound)
    b = jax.random.uniform(kb, (1, out_dim), jnp.float32, -bound, bound)
    return W, b


def build_params(key, gconv_in_dim, hidden_dim, nr_layers, nr_classes):
    flat = []
    for layer in range(nr_layers):
        fin = gconv_in_dim if layer == 0 else hidden_dim
        key, k1, k2, k3, k4 = jax.random.split(key, 5)
        We1, be1 = _init_linear(k1, 2 * fin + 1, hidden_dim)
        We2, be2 = _init_linear(k2, hidden_dim, hidden_dim)
        Wn1, bn1 = _init_linear(k3, fin + hidden_dim, hidden_dim)
        Wn2, bn2 = _init_linear(k4, hidden_dim, hidden_dim)
        flat += [We1, be1, We2, be2, Wn1, bn1, Wn2, bn2]
    key, k1, k2, k3, k4 = jax.random.split(key, 5)
    Wf1a, bf1a = _init_linear(k1, hidden_dim, hidden_dim)
    Wf1b, bf1b = _init_linear(k2, hidden_dim, hidden_dim)
    Wf2a, bf2a = _init_linear(k3, hidden_dim, hidden_dim)
    Wf2b, bf2b = _init_linear(k4, hidden_dim, nr_classes)
    flat += [Wf1a, bf1a, Wf1b, bf1b, Wf2a, bf2a, Wf2b, bf2b]
    return flat


# ---------------- pure-JAX reference (same math, f32, no Pallas) ----------------

def egnn_forward_ref(x, h, edge_index, flat, nr_layers):
    src, dst = edge_index[0], edge_index[1]
    N = x.shape[0]
    x_i, x_j = x[dst], x[src]
    dist = jnp.sum((x_i - x_j) ** 2, axis=1, keepdims=True)
    idx = 0
    for _ in range(nr_layers):
        We1, be1, We2, be2, Wn1, bn1, Wn2, bn2 = flat[idx:idx + 8]
        idx += 8
        h_i, h_j = h[dst], h[src]
        m = _silu(jnp.concatenate([h_i, h_j, dist], 1) @ We1 + be1)
        m = _silu(m @ We2 + be2)
        aggr = jax.ops.segment_sum(m, dst, num_segments=N)
        h = _silu(jnp.concatenate([h, aggr], 1) @ Wn1 + bn1) @ Wn2 + bn2
    Wf1a, bf1a, Wf1b, bf1b, Wf2a, bf2a, Wf2b, bf2b = flat[idx:idx + 8]
    g = _silu(h @ Wf1a + bf1a) @ Wf1b + bf1b
    pooled = jnp.sum(g, axis=0, keepdims=True)
    return _silu(pooled @ Wf2a + bf2a) @ Wf2b + bf2b


if __name__ == "__main__":
    # Small shapes consistent with the module's forward.
    N, E = 8, 16            # nodes, edges
    POS_DIM = 3             # coordinate dimension for x
    GCONV_IN_DIM = 4        # initial node-feature dim (h)
    HIDDEN_DIM = 32
    NR_LAYERS = 2
    NR_CLASSES = 5

    key = jax.random.PRNGKey(0)
    kx, kh, kp = jax.random.split(key, 3)

    x = jax.random.normal(kx, (N, POS_DIM), jnp.float32)
    h = jax.random.normal(kh, (N, GCONV_IN_DIM), jnp.float32)

    # Deterministic edge index: edge_index[0]=source j, edge_index[1]=target i.
    src = jnp.arange(E, dtype=jnp.int32) % N
    dst = (3 * jnp.arange(E, dtype=jnp.int32) + 1) % N
    edge_index = jnp.stack([src, dst], axis=0)

    flat_params = build_params(kp, GCONV_IN_DIM, HIDDEN_DIM, NR_LAYERS, NR_CLASSES)

    out = egnn_forward_pallas(x, h, edge_index, flat_params,
                              GCONV_IN_DIM, HIDDEN_DIM, NR_LAYERS, NR_CLASSES)
    out = jax.block_until_ready(out)

    ref = egnn_forward_ref(x, h, edge_index, flat_params, NR_LAYERS)
    assert out.shape == (1, NR_CLASSES), out.shape
    # bf16 MXU operands -> loosened tolerance vs the f32 reference.
    assert jnp.allclose(out, ref, rtol=5e-2, atol=5e-2), (out, ref)

    print("KERNEL_OK")
</pallas_src>

<mosaic_0001>
module attributes {stable_mosaic.version = 11 : i64} {
  func.func @kernel(%arg0: memref<16x1xi32, #tpu.memory_space<vmem>>, %arg1: memref<16x1xi32, #tpu.memory_space<vmem>>, %arg2: memref<8x3xf32, #tpu.memory_space<vmem>>, %arg3: memref<8x128xf32, #tpu.memory_space<vmem>>, %arg4: memref<2x6x128x128xbf16, #tpu.memory_space<vmem>>, %arg5: memref<2x5x128xf32, #tpu.memory_space<vmem>>, %arg6: memref<3x128x128xbf16, #tpu.memory_space<vmem>>, %arg7: memref<3x128xf32, #tpu.memory_space<vmem>>, %arg8: memref<128x128xbf16, #tpu.memory_space<vmem>>, %arg9: memref<1x128xf32, #tpu.memory_space<vmem>>, %arg10: memref<1x128xf32, #tpu.memory_space<vmem>>) attributes {dimension_semantics = [], scalar_prefetch = 0 : i64, scratch_operands = 0 : i64, tpu.core_type = #tpu.core_type<tc>} {
    %c0 = arith.constant 0 : index
    %c0_0 = arith.constant 0 : index
    %0 = vector.load %arg0[%c0, %c0_0] : memref<16x1xi32, #tpu.memory_space<vmem>>, vector<16x1xi32>
    %c0_1 = arith.constant 0 : index
    %c0_2 = arith.constant 0 : index
    %1 = vector.load %arg1[%c0_1, %c0_2] : memref<16x1xi32, #tpu.memory_space<vmem>>, vector<16x1xi32>
    %c0_3 = arith.constant 0 : index
    %c0_4 = arith.constant 0 : index
    %2 = vector.load %arg2[%c0_3, %c0_4] : memref<8x3xf32, #tpu.memory_space<vmem>>, vector<8x3xf32>
    %c0_5 = arith.constant 0 : index
    %c0_6 = arith.constant 0 : index
    %3 = vector.load %arg3[%c0_5, %c0_6] : memref<8x128xf32, #tpu.memory_space<vmem>>, vector<8x128xf32>
    %4 = tpu.iota {dimensions = array<i32: 1>} : vector<16x8xi32>
    %5 = vector.broadcast %0 : vector<16x1xi32> to vector<16x8xi32>
    %6 = arith.cmpi eq, %5, %4 : vector<16x8xi32>
    %7 = vector.broadcast %1 : vector<16x1xi32> to vector<16x8xi32>
    %8 = arith.cmpi eq, %7, %4 : vector<16x8xi32>
    %9 = arith.extui %6 : vector<16x8xi1> to vector<16x8xi32>
    %10 = arith.sitofp %9 : vector<16x8xi32> to vector<16x8xf32>
    %11 = arith.extui %8 : vector<16x8xi1> to vector<16x8xi32>
    %12 = arith.sitofp %11 : vector<16x8xi32> to vector<16x8xf32>
    %13 = arith.subf %10, %12 : vector<16x8xf32>
    %cst = arith.constant dense<0.000000e+00> : vector<16x3xf32>
    %14 = tpu.matmul %13, %2, %cst {dimension_numbers = #tpu.dot_dimension_numbers<[1], [0], [0], [1], [0, 0, 1, 1], [], []>} : vector<16x8xf32>, vector<8x3xf32>, vector<16x3xf32> -> vector<16x3xf32>
    %15 = arith.mulf %14, %14 : vector<16x3xf32>
    %cst_7 = arith.constant dense<0.000000e+00> : vector<16xf32>
    %16 = vector.multi_reduction <add>, %15, %cst_7 [1] : vector<16x3xf32> to vector<16xf32>
    %17 = vector.shape_cast %16 : vector<16xf32> to vector<16x1xf32>
    %18 = arith.extui %6 : vector<16x8xi1> to vector<16x8xi32>
    %19 = arith.sitofp %18 : vector<16x8xi32> to vector<16x8xf32>
    %20 = arith.truncf %19 : vector<16x8xf32> to vector<16x8xbf16>
    %21 = arith.extui %8 : vector<16x8xi1> to vector<16x8xi32>
    %22 = arith.sitofp %21 : vector<16x8xi32> to vector<16x8xf32>
    %23 = arith.truncf %22 : vector<16x8xf32> to vector<16x8xbf16>
    %24 = arith.truncf %3 : vector<8x128xf32> to vector<8x128xbf16>
    %c0_8 = arith.constant 0 : index
    %c0_9 = arith.constant 0 : index
    %c0_10 = arith.constant 0 : index
    %c0_11 = arith.constant 0 : index
    %25 = vector.load %arg4[%c0_8, %c0_9, %c0_10, %c0_11] : memref<2x6x128x128xbf16, #tpu.memory_space<vmem>>, vector<1x1x128x128xbf16>
    %26 = vector.shape_cast %25 : vector<1x1x128x128xbf16> to vector<128x128xbf16>
    %cst_12 = arith.constant dense<0.000000e+00> : vector<8x128xf32>
    %27 = tpu.matmul %24, %26, %cst_12 {dimension_numbers = #tpu.dot_dimension_numbers<[1], [0], [0], [1], [0, 0, 1, 1], [], []>} : vector<8x128xbf16>, vector<128x128xbf16>, vector<8x128xf32> -> vector<8x128xf32>
    %28 = arith.truncf %27 : vector<8x128xf32> to vector<8x128xbf16>
    %c0_13 = arith.constant 0 : index
    %c1 = arith.constant 1 : index
    %c0_14 = arith.constant 0 : index
    %c0_15 = arith.constant 0 : index
    %29 = vector.load %arg4[%c0_13, %c1, %c0_14, %c0_15] : memref<2x6x128x128xbf16, #tpu.memory_space<vmem>>, vector<1x1x128x128xbf16>
    %30 = vector.shape_cast %29 : vector<1x1x128x128xbf16> to vector<128x128xbf16>
    %cst_16 = arith.constant dense<0.000000e+00> : vector<8x128xf32>
    %31 = tpu.matmul %24, %30, %cst_16 {dimension_numbers = #tpu.dot_dimension_numbers<[1], [0], [0], [1], [0, 0, 1, 1], [], []>} : vector<8x128xbf16>, vector<128x128xbf16>, vector<8x128xf32> -> vector<8x128xf32>
    %32 = arith.truncf %31 : vector<8x128xf32> to vector<8x128xbf16>
    %cst_17 = arith.constant dense<0.000000e+00> : vector<16x128xf32>
    %33 = tpu.matmul %20, %28, %cst_17 {dimension_numbers = #tpu.dot_dimension_numbers<[1], [0], [0], [1], [0, 0, 1, 1], [], []>} : vector<16x8xbf16>, vector<8x128xbf16>, vector<16x128xf32> -> vector<16x128xf32>
    %cst_18 = arith.constant dense<0.000000e+00> : vector<16x128xf32>
    %34 = tpu.matmul %23, %32, %cst_18 {dimension_numbers = #tpu.dot_dimension_numbers<[1], [0], [0], [1], [0, 0, 1, 1], [], []>} : vector<16x8xbf16>, vector<8x128xbf16>, vector<16x128xf32> -> vector<16x128xf32>
    %35 = arith.addf %33, %34 : vector<16x128xf32>
    %c0_19 = arith.constant 0 : index
    %c0_20 = arith.constant 0 : index
    %c0_21 = arith.constant 0 : index
    %36 = vector.load %arg5[%c0_19, %c0_20, %c0_21] : memref<2x5x128xf32, #tpu.memory_space<vmem>>, vector<1x1x128xf32>
    %37 = vector.shape_cast %36 : vector<1x1x128xf32> to vector<1x128xf32>
    %38 = vector.broadcast %17 : vector<16x1xf32> to vector<16x128xf32>
    %39 = vector.broadcast %37 : vector<1x128xf32> to vector<16x128xf32>
    %40 = arith.mulf %38, %39 : vector<16x128xf32>
    %41 = arith.addf %35, %40 : vector<16x128xf32>
    %c0_22 = arith.constant 0 : index
    %c1_23 = arith.constant 1 : index
    %c0_24 = arith.constant 0 : index
    %42 = vector.load %arg5[%c0_22, %c1_23, %c0_24] : memref<2x5x128xf32, #tpu.memory_space<vmem>>, vector<1x1x128xf32>
    %43 = vector.shape_cast %42 : vector<1x1x128xf32> to vector<1x128xf32>
    %44 = vector.broadcast %43 : vector<1x128xf32> to vector<16x128xf32>
    %45 = arith.addf %41, %44 : vector<16x128xf32>
    %46 = arith.negf %45 : vector<16x128xf32>
    %47 = math.exp %46 : vector<16x128xf32>
    %cst_25 = arith.constant 1.000000e+00 : f32
    %48 = vector.broadcast %cst_25 : f32 to vector<16x128xf32>
    %49 = arith.addf %48, %47 : vector<16x128xf32>
    %50 = arith.divf %48, %49 : vector<16x128xf32>
    %51 = arith.mulf %45, %50 : vector<16x128xf32>
    %52 = arith.truncf %51 : vector<16x128xf32> to vector<16x128xbf16>
    %c0_26 = arith.constant 0 : index
    %c2 = arith.constant 2 : index
    %c0_27 = arith.constant 0 : index
    %c0_28 = arith.constant 0 : index
    %53 = vector.load %arg4[%c0_26, %c2, %c0_27, %c0_28] : memref<2x6x128x128xbf16, #tpu.memory_space<vmem>>, vector<1x1x128x128xbf16>
    %54 = vector.shape_cast %53 : vector<1x1x128x128xbf16> to vector<128x128xbf16>
    %cst_29 = arith.constant dense<0.000000e+00> : vector<16x128xf32>
    %55 = tpu.matmul %52, %54, %cst_29 {dimension_numbers = #tpu.dot_dimension_numbers<[1], [0], [0], [1], [0, 0, 1, 1], [], []>} : vector<16x128xbf16>, vector<128x128xbf16>, vector<16x128xf32> -> vector<16x128xf32>
    %c0_30 = arith.constant 0 : index
    %c2_31 = arith.constant 2 : index
    %c0_32 = arith.constant 0 : index
    %56 = vector.load %arg5[%c0_30, %c2_31, %c0_32] : memref<2x5x128xf32, #tpu.memory_space<vmem>>, vector<1x1x128xf32>
    %57 = vector.shape_cast %56 : vector<1x1x128xf32> to vector<1x128xf32>
    %58 = vector.broadcast %57 : vector<1x128xf32> to vector<16x128xf32>
    %59 = arith.addf %55, %58 : vector<16x128xf32>
    %60 = arith.negf %59 : vector<16x128xf32>
    %61 = math.exp %60 : vector<16x128xf32>
    %cst_33 = arith.constant 1.000000e+00 : f32
    %62 = vector.broadcast %cst_33 : f32 to vector<16x128xf32>
    %63 = arith.addf %62, %61 : vector<16x128xf32>
    %64 = arith.divf %62, %63 : vector<16x128xf32>
    %65 = arith.mulf %59, %64 : vector<16x128xf32>
    %66 = arith.truncf %65 : vector<16x128xf32> to vector<16x128xbf16>
    %cst_34 = arith.constant dense<0.000000e+00> : vector<8x128xf32>
    %67 = tpu.matmul %20, %66, %cst_34 {dimension_numbers = #tpu.dot_dimension_numbers<[0], [0], [1], [1], [0, 1, 1, 1], [], []>} : vector<16x8xbf16>, vector<16x128xbf16>, vector<8x128xf32> -> vector<8x128xf32>
    %c0_35 = arith.constant 0 : index
    %c3 = arith.constant 3 : index
    %c0_36 = arith.constant 0 : index
    %c0_37 = arith.constant 0 : index
    %68 = vector.load %arg4[%c0_35, %c3, %c0_36, %c0_37] : memref<2x6x128x128xbf16, #tpu.memory_space<vmem>>, vector<1x1x128x128xbf16>
    %69 = vector.shape_cast %68 : vector<1x1x128x128xbf16> to vector<128x128xbf16>
    %cst_38 = arith.constant dense<0.000000e+00> : vector<8x128xf32>
    %70 = tpu.matmul %24, %69, %cst_38 {dimension_numbers = #tpu.dot_dimension_numbers<[1], [0], [0], [1], [0, 0, 1, 1], [], []>} : vector<8x128xbf16>, vector<128x128xbf16>, vector<8x128xf32> -> vector<8x128xf32>
    %71 = arith.truncf %67 : vector<8x128xf32> to vector<8x128xbf16>
    %c0_39 = arith.constant 0 : index
    %c4 = arith.constant 4 : index
    %c0_40 = arith.constant 0 : index
    %c0_41 = arith.constant 0 : index
    %72 = vector.load %arg4[%c0_39, %c4, %c0_40, %c0_41] : memref<2x6x128x128xbf16, #tpu.memory_space<vmem>>, vector<1x1x128x128xbf16>
    %73 = vector.shape_cast %72 : vector<1x1x128x128xbf16> to vector<128x128xbf16>
    %cst_42 = arith.constant dense<0.000000e+00> : vector<8x128xf32>
    %74 = tpu.matmul %71, %73, %cst_42 {dimension_numbers = #tpu.dot_dimension_numbers<[1], [0], [0], [1], [0, 0, 1, 1], [], []>} : vector<8x128xbf16>, vector<128x128xbf16>, vector<8x128xf32> -> vector<8x128xf32>
    %75 = arith.addf %70, %74 : vector<8x128xf32>
    %c0_43 = arith.constant 0 : index
    %c3_44 = arith.constant 3 : index
    %c0_45 = arith.constant 0 : index
    %76 = vector.load %arg5[%c0_43, %c3_44, %c0_45] : memref<2x5x128xf32, #tpu.memory_space<vmem>>, vector<1x1x128xf32>
    %77 = vector.shape_cast %76 : vector<1x1x128xf32> to vector<1x128xf32>
    %78 = vector.broadcast %77 : vector<1x128xf32> to vector<8x128xf32>
    %79 = arith.addf %75, %78 : vector<8x128xf32>
    %80 = arith.negf %79 : vector<8x128xf32>
    %81 = math.exp %80 : vector<8x128xf32>
    %cst_46 = arith.constant 1.000000e+00 : f32
    %82 = vector.broadcast %cst_46 : f32 to vector<8x128xf32>
    %83 = arith.addf %82, %81 : vector<8x128xf32>
    %84 = arith.divf %82, %83 : vector<8x128xf32>
    %85 = arith.mulf %79, %84 : vector<8x128xf32>
    %86 = arith.truncf %85 : vector<8x128xf32> to vector<8x128xbf16>
    %c0_47 = arith.constant 0 : index
    %c5 = arith.constant 5 : index
    %c0_48 = arith.constant 0 : index
    %c0_49 = arith.constant 0 : index
    %87 = vector.load %arg4[%c0_47, %c5, %c0_48, %c0_49] : memref<2x6x128x128xbf16, #tpu.memory_space<vmem>>, vector<1x1x128x128xbf16>
    %88 = vector.shape_cast %87 : vector<1x1x128x128xbf16> to vector<128x128xbf16>
    %cst_50 = arith.constant dense<0.000000e+00> : vector<8x128xf32>
    %89 = tpu.matmul %86, %88, %cst_50 {dimension_numbers = #tpu.dot_dimension_numbers<[1], [0], [0], [1], [0, 0, 1, 1], [], []>} : vector<8x128xbf16>, vector<128x128xbf16>, vector<8x128xf32> -> vector<8x128xf32>
    %c0_51 = arith.constant 0 : index
    %c4_52 = arith.constant 4 : index
    %c0_53 = arith.constant 0 : index
    %90 = vector.load %arg5[%c0_51, %c4_52, %c0_53] : memref<2x5x128xf32, #tpu.memory_space<vmem>>, vector<1x1x128xf32>
    %91 = vector.shape_cast %90 : vector<1x1x128xf32> to vector<1x128xf32>
    %92 = vector.broadcast %91 : vector<1x128xf32> to vector<8x128xf32>
    %93 = arith.addf %89, %92 : vector<8x128xf32>
    %94 = arith.truncf %93 : vector<8x128xf32> to vector<8x128xbf16>
    %c1_54 = arith.constant 1 : index
    %c0_55 = arith.constant 0 : index
    %c0_56 = arith.constant 0 : index
    %c0_57 = arith.constant 0 : index
    %95 = vector.load %arg4[%c1_54, %c0_55, %c0_56, %c0_57] : memref<2x6x128x128xbf16, #tpu.memory_space<vmem>>, vector<1x1x128x128xbf16>
    %96 = vector.shape_cast %95 : vector<1x1x128x128xbf16> to vector<128x128xbf16>
    %cst_58 = arith.constant dense<0.000000e+00> : vector<8x128xf32>
    %97 = tpu.matmul %94, %96, %cst_58 {dimension_numbers = #tpu.dot_dimension_numbers<[1], [0], [0], [1], [0, 0, 1, 1], [], []>} : vector<8x128xbf16>, vector<128x128xbf16>, vector<8x128xf32> -> vector<8x128xf32>
    %98 = arith.truncf %97 : vector<8x128xf32> to vector<8x128xbf16>
    %c1_59 = arith.constant 1 : index
    %c1_60 = arith.constant 1 : index
    %c0_61 = arith.constant 0 : index
    %c0_62 = arith.constant 0 : index
    %99 = vector.load %arg4[%c1_59, %c1_60, %c0_61, %c0_62] : memref<2x6x128x128xbf16, #tpu.memory_space<vmem>>, vector<1x1x128x128xbf16>
    %100 = vector.shape_cast %99 : vector<1x1x128x128xbf16> to vector<128x128xbf16>
    %cst_63 = arith.constant dense<0.000000e+00> : vector<8x128xf32>
    %101 = tpu.matmul %94, %100, %cst_63 {dimension_numbers = #tpu.dot_dimension_numbers<[1], [0], [0], [1], [0, 0, 1, 1], [], []>} : vector<8x128xbf16>, vector<128x128xbf16>, vector<8x128xf32> -> vector<8x128xf32>
    %102 = arith.truncf %101 : vector<8x128xf32> to vector<8x128xbf16>
    %cst_64 = arith.constant dense<0.000000e+00> : vector<16x128xf32>
    %103 = tpu.matmul %20, %98, %cst_64 {dimension_numbers = #tpu.dot_dimension_numbers<[1], [0], [0], [1], [0, 0, 1, 1], [], []>} : vector<16x8xbf16>, vector<8x128xbf16>, vector<16x128xf32> -> vector<16x128xf32>
    %cst_65 = arith.constant dense<0.000000e+00> : vector<16x128xf32>
    %104 = tpu.matmul %23, %102, %cst_65 {dimension_numbers = #tpu.dot_dimension_numbers<[1], [0], [0], [1], [0, 0, 1, 1], [], []>} : vector<16x8xbf16>, vector<8x128xbf16>, vector<16x128xf32> -> vector<16x128xf32>
    %105 = arith.addf %103, %104 : vector<16x128xf32>
    %c1_66 = arith.constant 1 : index
    %c0_67 = arith.constant 0 : index
    %c0_68 = arith.constant 0 : index
    %106 = vector.load %arg5[%c1_66, %c0_67, %c0_68] : memref<2x5x128xf32, #tpu.memory_space<vmem>>, vector<1x1x128xf32>
    %107 = vector.shape_cast %106 : vector<1x1x128xf32> to vector<1x128xf32>
    %108 = vector.broadcast %17 : vector<16x1xf32> to vector<16x128xf32>
    %109 = vector.broadcast %107 : vector<1x128xf32> to vector<16x128xf32>
    %110 = arith.mulf %108, %109 : vector<16x128xf32>
    %111 = arith.addf %105, %110 : vector<16x128xf32>
    %c1_69 = arith.constant 1 : index
    %c1_70 = arith.constant 1 : index
    %c0_71 = arith.constant 0 : index
    %112 = vector.load %arg5[%c1_69, %c1_70, %c0_71] : memref<2x5x128xf32, #tpu.memory_space<vmem>>, vector<1x1x128xf32>
    %113 = vector.shape_cast %112 : vector<1x1x128xf32> to vector<1x128xf32>
    %114 = vector.broadcast %113 : vector<1x128xf32> to vector<16x128xf32>
    %115 = arith.addf %111, %114 : vector<16x128xf32>
    %116 = arith.negf %115 : vector<16x128xf32>
    %117 = math.exp %116 : vector<16x128xf32>
    %cst_72 = arith.constant 1.000000e+00 : f32
    %118 = vector.broadcast %cst_72 : f32 to vector<16x128xf32>
    %119 = arith.addf %118, %117 : vector<16x128xf32>
    %120 = arith.divf %118, %119 : vector<16x128xf32>
    %121 = arith.mulf %115, %120 : vector<16x128xf32>
    %122 = arith.truncf %121 : vector<16x128xf32> to vector<16x128xbf16>
    %c1_73 = arith.constant 1 : index
    %c2_74 = arith.constant 2 : index
    %c0_75 = arith.constant 0 : index
    %c0_76 = arith.constant 0 : index
    %123 = vector.load %arg4[%c1_73, %c2_74, %c0_75, %c0_76] : memref<2x6x128x128xbf16, #tpu.memory_space<vmem>>, vector<1x1x128x128xbf16>
    %124 = vector.shape_cast %123 : vector<1x1x128x128xbf16> to vector<128x128xbf16>
    %cst_77 = arith.constant dense<0.000000e+00> : vector<16x128xf32>
    %125 = tpu.matmul %122, %124, %cst_77 {dimension_numbers = #tpu.dot_dimension_numbers<[1], [0], [0], [1], [0, 0, 1, 1], [], []>} : vector<16x128xbf16>, vector<128x128xbf16>, vector<16x128xf32> -> vector<16x128xf32>
    %c1_78 = arith.constant 1 : index
    %c2_79 = arith.constant 2 : index
    %c0_80 = arith.constant 0 : index
    %126 = vector.load %arg5[%c1_78, %c2_79, %c0_80] : memref<2x5x128xf32, #tpu.memory_space<vmem>>, vector<1x1x128xf32>
    %127 = vector.shape_cast %126 : vector<1x1x128xf32> to vector<1x128xf32>
    %128 = vector.broadcast %127 : vector<1x128xf32> to vector<16x128xf32>
    %129 = arith.addf %125, %128 : vector<16x128xf32>
    %130 = arith.negf %129 : vector<16x128xf32>
    %131 = math.exp %130 : vector<16x128xf32>
    %cst_81 = arith.constant 1.000000e+00 : f32
    %132 = vector.broadcast %cst_81 : f32 to vector<16x128xf32>
    %133 = arith.addf %132, %131 : vector<16x128xf32>
    %134 = arith.divf %132, %133 : vector<16x128xf32>
    %135 = arith.mulf %129, %134 : vector<16x128xf32>
    %136 = arith.truncf %135 : vector<16x128xf32> to vector<16x128xbf16>
    %cst_82 = arith.constant dense<0.000000e+00> : vector<8x128xf32>
    %137 = tpu.matmul %20, %136, %cst_82 {dimension_numbers = #tpu.dot_dimension_numbers<[0], [0], [1], [1], [0, 1, 1, 1], [], []>} : vector<16x8xbf16>, vector<16x128xbf16>, vector<8x128xf32> -> vector<8x128xf32>
    %c1_83 = arith.constant 1 : index
    %c3_84 = arith.constant 3 : index
    %c0_85 = arith.constant 0 : index
    %c0_86 = arith.constant 0 : index
    %138 = vector.load %arg4[%c1_83, %c3_84, %c0_85, %c0_86] : memref<2x6x128x128xbf16, #tpu.memory_space<vmem>>, vector<1x1x128x128xbf16>
    %139 = vector.shape_cast %138 : vector<1x1x128x128xbf16> to vector<128x128xbf16>
    %cst_87 = arith.constant dense<0.000000e+00> : vector<8x128xf32>
    %140 = tpu.matmul %94, %139, %cst_87 {dimension_numbers = #tpu.dot_dimension_numbers<[1], [0], [0], [1], [0, 0, 1, 1], [], []>} : vector<8x128xbf16>, vector<128x128xbf16>, vector<8x128xf32> -> vector<8x128xf32>
    %141 = arith.truncf %137 : vector<8x128xf32> to vector<8x128xbf16>
    %c1_88 = arith.constant 1 : index
    %c4_89 = arith.constant 4 : index
    %c0_90 = arith.constant 0 : index
    %c0_91 = arith.constant 0 : index
    %142 = vector.load %arg4[%c1_88, %c4_89, %c0_90, %c0_91] : memref<2x6x128x128xbf16, #tpu.memory_space<vmem>>, vector<1x1x128x128xbf16>
    %143 = vector.shape_cast %142 : vector<1x1x128x128xbf16> to vector<128x128xbf16>
    %cst_92 = arith.constant dense<0.000000e+00> : vector<8x128xf32>
    %144 = tpu.matmul %141, %143, %cst_92 {dimension_numbers = #tpu.dot_dimension_numbers<[1], [0], [0], [1], [0, 0, 1, 1], [], []>} : vector<8x128xbf16>, vector<128x128xbf16>, vector<8x128xf32> -> vector<8x128xf32>
    %145 = arith.addf %140, %144 : vector<8x128xf32>
    %c1_93 = arith.constant 1 : index
    %c3_94 = arith.constant 3 : index
    %c0_95 = arith.constant 0 : index
    %146 = vector.load %arg5[%c1_93, %c3_94, %c0_95] : memref<2x5x128xf32, #tpu.memory_space<vmem>>, vector<1x1x128xf32>
    %147 = vector.shape_cast %146 : vector<1x1x128xf32> to vector<1x128xf32>
    %148 = vector.broadcast %147 : vector<1x128xf32> to vector<8x128xf32>
    %149 = arith.addf %145, %148 : vector<8x128xf32>
    %150 = arith.negf %149 : vector<8x128xf32>
    %151 = math.exp %150 : vector<8x128xf32>
    %cst_96 = arith.constant 1.000000e+00 : f32
    %152 = vector.broadcast %cst_96 : f32 to vector<8x128xf32>
    %153 = arith.addf %152, %151 : vector<8x128xf32>
    %154 = arith.divf %152, %153 : vector<8x128xf32>
    %155 = arith.mulf %149, %154 : vector<8x128xf32>
    %156 = arith.truncf %155 : vector<8x128xf32> to vector<8x128xbf16>
    %c1_97 = arith.constant 1 : index
    %c5_98 = arith.constant 5 : index
    %c0_99 = arith.constant 0 : index
    %c0_100 = arith.constant 0 : index
    %157 = vector.load %arg4[%c1_97, %c5_98, %c0_99, %c0_100] : memref<2x6x128x128xbf16, #tpu.memory_space<vmem>>, vector<1x1x128x128xbf16>
    %158 = vector.shape_cast %157 : vector<1x1x128x128xbf16> to vector<128x128xbf16>
    %cst_101 = arith.constant dense<0.000000e+00> : vector<8x128xf32>
    %159 = tpu.matmul %156, %158, %cst_101 {dimension_numbers = #tpu.dot_dimension_numbers<[1], [0], [0], [1], [0, 0, 1, 1], [], []>} : vector<8x128xbf16>, vector<128x128xbf16>, vector<8x128xf32> -> vector<8x128xf32>
    %c1_102 = arith.constant 1 : index
    %c4_103 = arith.constant 4 : index
    %c0_104 = arith.constant 0 : index
    %160 = vector.load %arg5[%c1_102, %c4_103, %c0_104] : memref<2x5x128xf32, #tpu.memory_space<vmem>>, vector<1x1x128xf32>
    %161 = vector.shape_cast %160 : vector<1x1x128xf32> to vector<1x128xf32>
    %162 = vector.broadcast %161 : vector<1x128xf32> to vector<8x128xf32>
    %163 = arith.addf %159, %162 : vector<8x128xf32>
    %164 = arith.truncf %163 : vector<8x128xf32> to vector<8x128xbf16>
    %c0_105 = arith.constant 0 : index
    %c0_106 = arith.constant 0 : index
    %c0_107 = arith.constant 0 : index
    %165 = vector.load %arg6[%c0_105, %c0_106, %c0_107] : memref<3x128x128xbf16, #tpu.memory_space<vmem>>, vector<1x128x128xbf16>
    %166 = vector.shape_cast %165 : vector<1x128x128xbf16> to vector<128x128xbf16>
    %cst_108 = arith.constant dense<0.000000e+00> : vector<8x128xf32>
    %167 = tpu.matmul %164, %166, %cst_108 {dimension_numbers = #tpu.dot_dimension_numbers<[1], [0], [0], [1], [0, 0, 1, 1], [], []>} : vector<8x128xbf16>, vector<128x128xbf16>, vector<8x128xf32> -> vector<8x128xf32>
    %c0_109 = arith.constant 0 : index
    %c0_110 = arith.constant 0 : index
    %168 = vector.load %arg7[%c0_109, %c0_110] : memref<3x128xf32, #tpu.memory_space<vmem>>, vector<1x128xf32>
    %169 = vector.broadcast %168 : vector<1x128xf32> to vector<8x128xf32>
    %170 = arith.addf %167, %169 : vector<8x128xf32>
    %171 = arith.negf %170 : vector<8x128xf32>
    %172 = math.exp %171 : vector<8x128xf32>
    %cst_111 = arith.constant 1.000000e+00 : f32
    %173 = vector.broadcast %cst_111 : f32 to vector<8x128xf32>
    %174 = arith.addf %173, %172 : vector<8x128xf32>
    %175 = arith.divf %173, %174 : vector<8x128xf32>
    %176 = arith.mulf %170, %175 : vector<8x128xf32>
    %177 = arith.truncf %176 : vector<8x128xf32> to vector<8x128xbf16>
    %c1_112 = arith.constant 1 : index
    %c0_113 = arith.constant 0 : index
    %c0_114 = arith.constant 0 : index
    %178 = vector.load %arg6[%c1_112, %c0_113, %c0_114] : memref<3x128x128xbf16, #tpu.memory_space<vmem>>, vector<1x128x128xbf16>
    %179 = vector.shape_cast %178 : vector<1x128x128xbf16> to vector<128x128xbf16>
    %cst_115 = arith.constant dense<0.000000e+00> : vector<8x128xf32>
    %180 = tpu.matmul %177, %179, %cst_115 {dimension_numbers = #tpu.dot_dimension_numbers<[1], [0], [0], [1], [0, 0, 1, 1], [], []>} : vector<8x128xbf16>, vector<128x128xbf16>, vector<8x128xf32> -> vector<8x128xf32>
    %c1_116 = arith.constant 1 : index
    %c0_117 = arith.constant 0 : index
    %181 = vector.load %arg7[%c1_116, %c0_117] : memref<3x128xf32, #tpu.memory_space<vmem>>, vector<1x128xf32>
    %182 = vector.broadcast %181 : vector<1x128xf32> to vector<8x128xf32>
    %183 = arith.addf %180, %182 : vector<8x128xf32>
    %cst_118 = arith.constant dense<0.000000e+00> : vector<128xf32>
    %184 = vector.multi_reduction <add>, %183, %cst_118 [0] : vector<8x128xf32> to vector<128xf32>
    %185 = vector.shape_cast %184 : vector<128xf32> to vector<1x128xf32>
    %186 = arith.truncf %185 : vector<1x128xf32> to vector<1x128xbf16>
    %c2_119 = arith.constant 2 : index
    %c0_120 = arith.constant 0 : index
    %c0_121 = arith.constant 0 : index
    %187 = vector.load %arg6[%c2_119, %c0_120, %c0_121] : memref<3x128x128xbf16, #tpu.memory_space<vmem>>, vector<1x128x128xbf16>
    %188 = vector.shape_cast %187 : vector<1x128x128xbf16> to vector<128x128xbf16>
    %cst_122 = arith.constant dense<0.000000e+00> : vector<1x128xf32>
    %189 = tpu.matmul %186, %188, %cst_122 {dimension_numbers = #tpu.dot_dimension_numbers<[1], [0], [0], [1], [0, 0, 1, 1], [], []>} : vector<1x128xbf16>, vector<128x128xbf16>, vector<1x128xf32> -> vector<1x128xf32>
    %c2_123 = arith.constant 2 : index
    %c0_124 = arith.constant 0 : index
    %190 = vector.load %arg7[%c2_123, %c0_124] : memref<3x128xf32, #tpu.memory_space<vmem>>, vector<1x128xf32>
    %191 = arith.addf %189, %190 : vector<1x128xf32>
    %192 = arith.negf %191 : vector<1x128xf32>
    %193 = math.exp %192 : vector<1x128xf32>
    %cst_125 = arith.constant 1.000000e+00 : f32
    %194 = vector.broadcast %cst_125 : f32 to vector<1x128xf32>
    %195 = arith.addf %194, %193 : vector<1x128xf32>
    %196 = arith.divf %194, %195 : vector<1x128xf32>
    %197 = arith.mulf %191, %196 : vector<1x128xf32>
    %198 = arith.truncf %197 : vector<1x128xf32> to vector<1x128xbf16>
    %c0_126 = arith.constant 0 : index
    %c0_127 = arith.constant 0 : index
    %199 = vector.load %arg8[%c0_126, %c0_127] : memref<128x128xbf16, #tpu.memory_space<vmem>>, vector<128x128xbf16>
    %cst_128 = arith.constant dense<0.000000e+00> : vector<1x128xf32>
    %200 = tpu.matmul %198, %199, %cst_128 {dimension_numbers = #tpu.dot_dimension_numbers<[1], [0], [0], [1], [0, 0, 1, 1], [], []>} : vector<1x128xbf16>, vector<128x128xbf16>, vector<1x128xf32> -> vector<1x128xf32>
    %c0_129 = arith.constant 0 : index
    %c0_130 = arith.constant 0 : index
    %201 = vector.load %arg9[%c0_129, %c0_130] : memref<1x128xf32, #tpu.memory_space<vmem>>, vector<1x128xf32>
    %202 = arith.addf %200, %201 : vector<1x128xf32>
    %c0_131 = arith.constant 0 : index
    %c0_132 = arith.constant 0 : index
    %203 = vector.load %arg10[%c0_131, %c0_132] : memref<1x128xf32, #tpu.memory_space<vmem>>, vector<1x128xf32>
    tpu.vector_store %arg10[%c0_131, %c0_132], %202 {strides = array<i32>} : memref<1x128xf32, #tpu.memory_space<vmem>>, vector<1x128xf32>,
    return
  }
}

</mosaic_0001>

<bundles_post_ra>
// kernel: tpu_custom_call.1
= control target key start
LH: loop header
LB: loop body
LE: loop exit
PB: predicated region body
PF: predicated region fallthrough
CT: control target
= control target key end

     0   :  { %15 = vsyncpa [#allocation3], 0  ;;  %s3681_s0 = inlined_call_operand.vmem [shape: s32[16,1], index: 0, kind: input, shape index: {}]   ;;  %s3682_s1 = inlined_call_operand.vmem [shape: s32[16,1], index: 1, kind: input, shape index: {}]   ;;  %s3683_s2 = inlined_call_operand.vmem [shape: f32[8,3], index: 2, kind: input, shape index: {}]   ;;  %s3684_s3 = inlined_call_operand.vmem [shape: f32[8,128], index: 3, kind: input, shape index: {}]   ;;  %s3685_s4 = inlined_call_operand.hbm [shape: bf16[2,6,128,128], index: 4, kind: input, shape index: {}]   ;;  %s3686_s5 = inlined_call_operand.vmem [shape: f32[2,5,128], index: 5, kind: input, shape index: {}]   ;;  %s3687_s6 = inlined_call_operand.hbm [shape: bf16[3,128,128], index: 6, kind: input, shape index: {}]   ;;  %s3688_s7 = inlined_call_operand.vmem [shape: f32[3,128], index: 7, kind: input, shape index: {}]   ;;  %s3689_s8 = inlined_call_operand.vmem [shape: bf16[128,128], index: 8, kind: input, shape index: {}]   ;;  %s3690_s9 = inlined_call_operand.vmem [shape: f32[1,128], index: 9, kind: input, shape index: {}]   ;;  %s3691_s10 = inlined_call_operand.hbm [shape: f32[1,128], index: 10, kind: output, shape index: {}]  }
   0x1   :  { %16 = vsyncpa [#allocation6], 0 }
   0x2   :  { %17 = vsyncpa [#allocation4], 0  ;;  %s3297_s13 = smov [#allocation2]  }
   0x3   :  { %s31_s14 = sshll.u32 %s3297_s13, 4  ;;  %s32_s14 = int_to_ptr.vmem [resolvable:$true] %s31_s14 }
   0x4   :  { %s3239_s15 = scalar_lea.vmem %s32_s14, 12288  ;;  %p3244_p1 = scmp.lt.s32.totalorder %s32_s14, %s32_s14 }
   0x5   :  { %p3240_p0 = scmp.ne.s32.totalorder %s32_s14, %s3239_s15  ;;  %p3245_p2 = scmp.lt.s32.totalorder %s3239_s15, %s3239_s15 }
   0x7   :  { %p3246_p3 = por %p3245_p2, %p3244_p1 }
   0x9   :  { %p3247_p4 = pnand %p3246_p3, %p3240_p0 }
   0xb   :  { %3250 = shalt.err (!%p3247_p4)
}
   0xc   :  { %s3298_s16 = smov 64   ;;  %s3299_s17 = smov 4  }
   0xd   :  { %37 = dma.hbm_to_vmem [thread:$0]  %s3685_s4, 12288, %s32_s14, [#allocation3], %s3298_s16, %s3298_s16, %s3299_s17  }
   0xe   :  { %s3300_s20 = smov [#allocation5]  }
   0xf   :  { %s45_s21 = sshll.u32 %s3300_s20, 4  ;;  %s46_s21 = int_to_ptr.vmem [resolvable:$true] %s45_s21 }
  0x10   :  { %s3259_s22 = scalar_lea.vmem %s46_s21, 3072  ;;  %p3264_p6 = scmp.lt.s32.totalorder %s46_s21, %s46_s21 }
  0x11   :  { %p3260_p5 = scmp.ne.s32.totalorder %s46_s21, %s3259_s22  ;;  %p3265_p7 = scmp.lt.s32.totalorder %s3259_s22, %s3259_s22 }
  0x13   :  { %p3266_p8 = por %p3265_p7, %p3264_p6 }
  0x15   :  { %p3267_p9 = pnand %p3266_p8, %p3260_p5 }
  0x17   :  { %3270 = shalt.err (!%p3267_p9)
}
  0x18   :  { %51 = dma.hbm_to_vmem [thread:$0]  %s3687_s6, 3072, %s46_s21, [#allocation6], %s3298_s16, %s3298_s16, %s3299_s17  }
  0x19   :  { %3291 = dma.done.wait [#allocation3], 12288  }
  0x1a   :  { %3292 = vsyncadd [#allocation3], 4294955008 }
  0x1b   :  { %3293 = dma.done.wait [#allocation6], 3072  }
  0x1c   :  { %3294 = vsyncadd [#allocation6], 4294964224  ;;  %v3301_v0 = vmov 0   ;;  %v3302_v1 = vmov 0.0   ;;  %v66_v2 = vld [vmem:[%s3681_s0 + $0x8] sm:$0xff]  ;;  %v65_v3 = vld [vmem:[%s3681_s0] sm:$0xff]  ;;  %v71_v17 = vlaneseq }
  0x1d   :  { %3054 = vset.pattern.permute.xlu1 %v3301_v0  ;;  %3053 = vset.pattern.permute.xlu0 %v3301_v0  ;;  %v68_v4 = vld [vmem:[%s3682_s1 + $0x8] sm:$0xff]  ;;  %v67_v5 = vld [vmem:[%s3682_s1] sm:$0xff]  ;;  %v3056_v7 = vld [vmem:[#allocation2 + $0x38] sm:$0xff]   ;;  %vm3303_vm0 = vmmov 0   ;;  %vm99_vm5 = vcmask 64512   ;;  %vm183_vm6 = vcmask 23552  }
  0x1e   :  { %2689 = vmatprep.subr.bf16.mxu1 %v3302_v1  ;;  %77 = vperm.xlu1 %3054, %v66_v2   ;;  %v69_v6 = vld [vmem:[%s3683_s2] sm:$0xff]  ;;  %v3058_v8 = vld [vmem:[#allocation2 + $0x30] sm:$0xff]   ;;  %v3060_v9 = vld [vmem:[#allocation2 + $0x28] sm:$0xff]   ;;  %v72_v18 = vand.u32 127, %v71_v17  ;;  %vm407_vm7 = vcmask 1043456   ;;  %vm672_vm8 = vcmask 130048  }
  0x1f   :  { %74 = vperm.xlu0 %3053, %v65_v3   ;;  %2684 = vmatprep.subr.mxu0 %v69_v6  ;;  %v3062_v10 = vld [vmem:[#allocation2 + $0x20] sm:$0xff]   ;;  %v3064_v11 = vld [vmem:[#allocation2 + $0x18] sm:$0xff]   ;;  %v3066_v12 = vld [vmem:[#allocation2 + $0x10] sm:$0xff]   ;;  %s3304_s26 = smov [#allocation7]  }
  0x20   :  { %2685 = vmatpush3.msra.mxu0 %v69_v6  ;;  %2690 = vmatpush3.bf16.msra.mxu1 %v3056_v7  ;;  %v3068_v13 = vld [vmem:[#allocation2 + $0x8] sm:$0xff]   ;;  %v3070_v14 = vld [vmem:[#allocation2] sm:$0xff]   ;;  %v3055_v31 = vld [vmem:[#allocation2 + $0x78] sm:$0xff]  }
  0x21   :  { %2709 = vmatprep.subr.bf16.mxu0 %v3302_v1  ;;  %2691 = vmatprep.subr.bf16.mxu1 %v3302_v1  ;;  %v70_v15 = vld [vmem:[%s3684_s3] sm:$0xff]  ;;  %v3057_v32 = vld [vmem:[#allocation2 + $0x70] sm:$0xff]   ;;  %v3059_v33 = vld [vmem:[#allocation2 + $0x68] sm:$0xff]  }
  0x22   :  { %85 = vperm.xlu1 %3054, %v68_v4   ;;  %2705 = vmatprep.mubr.msk.bf16.mxu1 %vm3303_vm0, %v3302_v1  ;;  %v3395_v16 = vpack.c.bf16 %v70_v15, %v70_v15  ;;  %v3061_v34 = vld [vmem:[#allocation2 + $0x60] sm:$0xff]   ;;  %v3063_v35 = vld [vmem:[#allocation2 + $0x58] sm:$0xff]   ;;  %v3065_v36 = vld [vmem:[#allocation2 + $0x50] sm:$0xff]  }
  0x23   :  { %82 = vperm.xlu0 %3053, %v67_v5   ;;  %v3067_v37 = vld [vmem:[#allocation2 + $0x48] sm:$0xff]   ;;  %v3069_v38 = vld [vmem:[#allocation2 + $0x40] sm:$0xff]   ;;  %v3071_v57 = vld [vmem:[#allocation2 + $0xb8] sm:$0xff]  }
  0x24   :  { %2692 = vmatpush3.bf16.msra.mxu1 %v3058_v8  ;;  %v3072_v58 = vld [vmem:[#allocation2 + $0xb0] sm:$0xff]   ;;  %v3073_v59 = vld [vmem:[#allocation2 + $0xa8] sm:$0xff]   ;;  %v3074_v60 = vld [vmem:[#allocation2 + $0xa0] sm:$0xff]  }
  0x25   :  { %2693 = vmatprep.subr.bf16.mxu1 %v3302_v1  ;;  %v3075_v61 = vld [vmem:[#allocation2 + $0x98] sm:$0xff]   ;;  %v3076_v62 = vld [vmem:[#allocation2 + $0x90] sm:$0xff]   ;;  %v3077_v63 = vld [vmem:[#allocation2 + $0x88] sm:$0xff]  }
  0x26   :  { %v3078_v0 = vld [vmem:[#allocation2 + $0x80] sm:$0xff]  }
  0x27   :  { %v2380_v7 = vld [vmem:[%s3686_s5] ss:$0 sm:$0xff] }
  0x28   :  { %2694 = vmatpush3.bf16.msra.mxu1 %v3060_v9 }
  0x29   :  { %2695 = vmatprep.subr.bf16.mxu1 %v3302_v1 }
  0x2c   :  { %2696 = vmatpush3.bf16.msra.mxu1 %v3062_v10 }
  0x2d   :  { %2697 = vmatprep.subr.bf16.mxu1 %v3302_v1 }
  0x30   :  { %2698 = vmatpush3.bf16.msra.mxu1 %v3064_v11 }
  0x31   :  { %2699 = vmatprep.subr.bf16.mxu1 %v3302_v1 }
  0x34   :  { %2700 = vmatpush3.bf16.msra.mxu1 %v3066_v12  ;;  %v2381_v12 = vld [vmem:[%s3686_s5 + $0x1] ss:$0 sm:$0xff] }
  0x35   :  { %2701 = vmatprep.subr.bf16.mxu1 %v3302_v1 }
  0x38   :  { %2702 = vmatpush3.bf16.msra.mxu1 %v3068_v13 }
  0x39   :  { %2703 = vmatprep.subr.bf16.mxu1 %v3302_v1 }
  0x3c   :  { %2704 = vmatpush3.bf16.msra.mxu1 %v3070_v14 }
  0x3d   :  { %2741 = vmatprep.subr.bf16.mxu1 %v3302_v1 }
  0x3f   :  { %2706 = vmatmul.mubr.bf16.vlgmr.msra.gmra.mxu1 %v3395_v16 }
  0x40   :  { %2757 = vmatprep.mubr.msk.bf16.mxu1 %vm3303_vm0, %v3302_v1  ;;  %2742 = vmatpush3.bf16.msra.mxu1 %v3071_v57 }
  0x41   :  { %2743 = vmatprep.subr.bf16.mxu1 %v3302_v1 }
  0x44   :  { %2744 = vmatpush3.bf16.msra.mxu1 %v3072_v58 }
  0x45   :  { %2745 = vmatprep.subr.bf16.mxu1 %v3302_v1 }
  0x48   :  { %2746 = vmatpush3.bf16.msra.mxu1 %v3073_v59 }
  0x49   :  { %2747 = vmatprep.subr.bf16.mxu1 %v3302_v1 }
  0x4c   :  { %2748 = vmatpush3.bf16.msra.mxu1 %v3074_v60 }
  0x4d   :  { %2749 = vmatprep.subr.bf16.mxu1 %v3302_v1 }
  0x50   :  { %2750 = vmatpush3.bf16.msra.mxu1 %v3075_v61 }
  0x51   :  { %2751 = vmatprep.subr.bf16.mxu1 %v3302_v1 }
  0x54   :  { %2752 = vmatpush3.bf16.msra.mxu1 %v3076_v62  ;;  %v3081_v62 = vld [vmem:[#allocation2 + $0x138] sm:$0xff]  }
  0x55   :  { %2753 = vmatprep.subr.bf16.mxu1 %v3302_v1 }
  0x58   :  { %2754 = vmatpush3.bf16.msra.mxu1 %v3077_v63  ;;  %v3083_v63 = vld [vmem:[#allocation2 + $0x130] sm:$0xff]  }
  0x59   :  { %2755 = vmatprep.subr.bf16.mxu1 %v3302_v1 }
  0x5c   :  { %2756 = vmatpush3.bf16.msra.mxu1 %v3078_v0  ;;  %v3085_v0 = vld [vmem:[#allocation2 + $0x128] sm:$0xff]  }
  0x5d   :  { %2787 = vmatprep.subr.bf16.mxu1 %v3302_v1 }
  0x99   :  { %v78_v19 = vpop.permute.xlu1 %77 }
  0x9a   :  { %v75_v20 = vpop.permute.xlu0 %74  ;;  %vm80_vm1 = vcmp.eq.s32.totalorder %v78_v19, %v72_v18 }
  0x9b   :  { %vm79_vm2 = vcmp.eq.s32.totalorder %v75_v20, %v72_v18  ;;  %v2357_v21 = vsel %vm80_vm1, 1.0, %v3302_v1 }
  0x9c   :  { %v2356_v22 = vsel %vm79_vm2, 1.0, %v3302_v1 }
  0x9d   :  { %v3403_v23 = vpack.c.bf16 %v2357_v21, %v2356_v22  ;;  %v86_v24 = vpop.permute.xlu1 %85 }
  0x9e   :  { %v83_v25 = vpop.permute.xlu0 %82  ;;  %vm88_vm3 = vcmp.eq.s32.totalorder %v86_v24, %v72_v18 }
  0x9f   :  { %vm87_vm4 = vcmp.eq.s32.totalorder %v83_v25, %v72_v18  ;;  %v2359_v26 = vsel %vm88_vm3, 1.0, %v3302_v1 }
  0xa0   :  { %v2358_v27 = vsel %vm87_vm4, 1.0, %v3302_v1  ;;  %v98_v28 = vsub.f32 %v2357_v21, %v2359_v26 }
  0xa1   :  { %v3407_v29 = vpack.c.bf16 %v2359_v26, %v2358_v27  ;;  %v97_v30 = vsub.f32 %v2356_v22, %v2358_v27 }
  0xa3   :  { %2686 = vmatprep.mubr.msk.f32.mxu0 %vm99_vm5, %v97_v30 }
  0xa4   :  { %2687 = vmatmul.mubr.msk.f32.vlgmr.msra.gmra.mxu0 %vm99_vm5, %v98_v28 }
  0xa5   :  { %2710 = vmatpush3.bf16.msra.mxu0 %v3055_v31  ;;  %2725 = vmatprep.mubr.msk.bf16.mxu0 %vm3303_vm0, %v3302_v1 }
  0xa6   :  { %2711 = vmatprep.subr.bf16.mxu0 %v3302_v1 }
  0xa9   :  { %2712 = vmatpush3.bf16.msra.mxu0 %v3057_v32 }
  0xaa   :  { %2713 = vmatprep.subr.bf16.mxu0 %v3302_v1 }
  0xad   :  { %2714 = vmatpush3.bf16.msra.mxu0 %v3059_v33 }
  0xae   :  { %2715 = vmatprep.subr.bf16.mxu0 %v3302_v1 }
  0xb1   :  { %2716 = vmatpush3.bf16.msra.mxu0 %v3061_v34 }
  0xb2   :  { %2717 = vmatprep.subr.bf16.mxu0 %v3302_v1 }
  0xb5   :  { %2718 = vmatpush3.bf16.msra.mxu0 %v3063_v35 }
  0xb6   :  { %2719 = vmatprep.subr.bf16.mxu0 %v3302_v1 }
  0xb9   :  { %2720 = vmatpush3.bf16.msra.mxu0 %v3065_v36  ;;  %v3079_v36 = vld [vmem:[#allocation2 + $0xf8] sm:$0xff]  }
  0xba   :  { %2721 = vmatprep.subr.bf16.mxu0 %v3302_v1 }
  0xbd   :  { %2722 = vmatpush3.bf16.msra.mxu0 %v3067_v37  ;;  %v3080_v37 = vld [vmem:[#allocation2 + $0xf0] sm:$0xff]  }
  0xbe   :  { %2723 = vmatprep.subr.bf16.mxu0 %v3302_v1 }
  0xc1   :  { %2724 = vmatpush3.bf16.msra.mxu0 %v3069_v38  ;;  %v3082_v38 = vld [vmem:[#allocation2 + $0xe8] sm:$0xff]  }
  0xc2   :  { %2729 = vmatprep.subr.bf16.mxu0 %v3302_v1 }
  0xc4   :  { %2726 = vmatmul.mubr.bf16.vlgmr.msra.gmra.mxu0 %v3395_v16 }
  0xc5   :  { %2731 = vmatprep.mubr.msk.bf16.mxu0 %vm3303_vm0, %v3302_v1 }
  0xff   :  { %v291_v39 = vpop.f32.mrf.mxu1 }
 0x100   :  { %v297_v51 = vpack.c.bf16 %v291_v39, %v291_v39  ;;  %v3084_v39 = vld [vmem:[#allocation2 + $0xe0] sm:$0xff]  }
 0x101   :  { %v2707_v40 = vpop.f32.mrf.mxu1 }
 0x102   :  { %v456_v55 = vsel %vm407_vm7, %v297_v51, 0  ;;  %v3086_v40 = vld [vmem:[#allocation2 + $0xd8] sm:$0xff]  }
 0x103   :  { %v294_v41 = vpop.f32.mrf.mxu1 }
 0x104   :  { %v3088_v41 = vld [vmem:[#allocation2 + $0xd0] sm:$0xff]  }
 0x105   :  { %v2708_v42 = vpop.f32.mrf.mxu1 }
 0x106   :  { %v3090_v42 = vld [vmem:[#allocation2 + $0xc8] sm:$0xff]  }
 0x164   :  { %v2688_v43 = vpop.f32.mrf.mxu0 }
 0x165   :  { %v182_v44 = vmul.f32 %v2688_v43, %v2688_v43  ;;  %v3092_v43 = vld [vmem:[#allocation2 + $0xc0] sm:$0xff]  }
 0x166   :  { %v172_v45 = vpop.f32.mrf.mxu0 }
 0x167   :  { %v181_v46 = vmul.f32 %v172_v45, %v172_v45  ;;  %v187_v47 = vsel %vm183_vm6, %v182_v44, 0.0  ;;  %v2384_v44 = vld [vmem:[%s3686_s5 + $0x2] ss:$0 sm:$0xff] }
 0x168   :  { %188 = vadd.xlane.f32.xlu1 %v187_v47 }
 0x169   :  { %v184_v48 = vsel %vm183_vm6, %v181_v46, 0.0 }
 0x16a   :  { %185 = vadd.xlane.f32.xlu0 %v184_v48 }
 0x184   :  { %v397_v49 = vpop.f32.mrf.mxu0 }
 0x185   :  { %v403_v50 = vpack.c.bf16 %v397_v49, %v397_v49 }
 0x186   :  { %v2727_v52 = vpop.f32.mrf.mxu0 }
 0x187   :  { %v409_v53 = vsel %vm407_vm7, %v403_v50, 0 }
 0x188   :  { %v400_v54 = vpop.f32.mrf.mxu0  ;;  %2730 = vmatpush3.bf16.msra.mxu0 %v409_v53 }
 0x189   :  { %2735 = vmatprep.subr.bf16.mxu0 %v3302_v1 }
 0x18a   :  { %v2728_v56 = vpop.f32.mrf.mxu0 }
 0x18b   :  { %2732 = vmatmul.mubr.msk.bf16.vlgmr.msra.gmra.mxu0 %vm99_vm5, %v3407_v29 }
 0x18c   :  { %2736 = vmatpush3.bf16.msra.mxu0 %v456_v55  ;;  %2737 = vmatprep.mubr.msk.bf16.mxu0 %vm3303_vm0, %v3302_v1 }
 0x18d   :  { %2761 = vmatprep.subr.bf16.mxu0 %v3302_v1 }
 0x193   :  { %2738 = vmatmul.mubr.msk.bf16.vlgmr.msra.gmra.mxu0 %vm99_vm5, %v3403_v23 }
 0x194   :  { %2763 = vmatprep.mubr.msk.bf16.mxu0 %vm3303_vm0, %v3302_v1 }
 0x197   :  { %656 = vxpose.xlu0.c.b16.start.end [1/1] (short) (narrow) %v3403_v23, 16 }
 0x1f1   :  { %v3451_v11 = vpop.xlane.xlu1 %188 }
 0x1f2   :  { %v505_v17 = vmul.f32 %v2380_v7, %v3451_v11 }
 0x1f3   :  { %v3445_v5 = vpop.xlane.xlu0 %185 }
 0x1f4   :  { %v504_v9 = vmul.f32 %v2380_v7, %v3445_v5  ;;  %v3094_v7 = vld [vmem:[#allocation2 + $0x100] sm:$0xff]  }
 0x1f9   :  { %v3473_v61 = vpop.trf.xlu0 }
 0x24b   :  { %v445_v2 = vpop.f32.mrf.mxu0 }
 0x24d   :  { %v2733_v3 = vpop.f32.mrf.mxu0 }
 0x24e   :  { %v3089_v3 = vld [vmem:[#allocation2 + $0x118] sm:$0xff]  }
 0x24f   :  { %v448_v4 = vpop.f32.mrf.mxu0 }
 0x251   :  { %v2734_v6 = vpop.f32.mrf.mxu0 }
 0x252   :  { %v3093_v6 = vld [vmem:[#allocation2 + $0x108] sm:$0xff]  }
 0x253   :  { %v492_v8 = vpop.f32.mrf.mxu0 }
 0x254   :  { %v493_v10 = vadd.f32 %v492_v8, %v445_v2  ;;  %v3087_v2 = vld [vmem:[#allocation2 + $0x120] sm:$0xff]  }
 0x255   :  { %v2739_v13 = vpop.f32.mrf.mxu0 }
 0x256   :  { %v506_v14 = vadd.f32 %v504_v9, %v493_v10 }
 0x257   :  { %v495_v15 = vpop.f32.mrf.mxu0 }
 0x258   :  { %v513_v18 = vadd.f32 %v2381_v12, %v506_v14  ;;  %v496_v19 = vadd.f32 %v495_v15, %v448_v4  ;;  %v3091_v4 = vld [vmem:[#allocation2 + $0x110] sm:$0xff]  }
 0x259   :  { %v2740_v20 = vpop.f32.mrf.mxu0 }
 0x25a   :  { %v2382_v21 = vmul.f32 -1.442695, %v513_v18  ;;  %v507_v22 = vadd.f32 %v505_v17, %v496_v19  ;;  %v3095_v19 = vld [vmem:[#allocation2 + $0x178] sm:$0xff]   ;;  %v3096_v20 = vld [vmem:[#allocation2 + $0x170] sm:$0xff]  }
 0x25c   :  { %3183 = vpow2.f32 %v2382_v21  ;;  %v514_v24 = vadd.f32 %v2381_v12, %v507_v22  ;;  %v3097_v21 = vld [vmem:[#allocation2 + $0x168] sm:$0xff]   ;;  %v3098_v22 = vld [vmem:[#allocation2 + $0x160] sm:$0xff]  }
 0x25e   :  { %v2383_v25 = vmul.f32 -1.442695, %v514_v24 }
 0x260   :  { %3185 = vpow2.f32 %v2383_v25  ;;  %v3100_v25 = vld [vmem:[#allocation2 + $0x150] sm:$0xff]  }
 0x269   :  { %v3184_v26 = vpop.eup %3183 }
 0x26a   :  { %v521_v27 = vadd.f32 1.0, %v3184_v26  ;;  %v3101_v26 = vld [vmem:[#allocation2 + $0x148] sm:$0xff]  }
 0x26c   :  { %3187 = vrcp.f32 %v521_v27  ;;  %v3102_v27 = vld [vmem:[#allocation2 + $0x140] sm:$0xff]  }
 0x26d   :  { %v3186_v28 = vpop.eup %3185 }
 0x26e   :  { %v522_v30 = vadd.f32 1.0, %v3186_v28  ;;  %v3103_v28 = vld [vmem:[#allocation2 + $0x1b8] sm:$0xff]  }
 0x270   :  { %3189 = vrcp.f32 %v522_v30  ;;  %v3105_v30 = vld [vmem:[#allocation2 + $0x1b0] sm:$0xff]  }
 0x279   :  { %v3188_v31 = vpop.eup %3187 }
 0x27a   :  { %v527_v33 = vmul.f32 %v3188_v31, %v513_v18  ;;  %v3107_v31 = vld [vmem:[#allocation2 + $0x1a8] sm:$0xff]  }
 0x27d   :  { %v3190_v32 = vpop.eup %3189 }
 0x27e   :  { %v528_v34 = vmul.f32 %v3190_v32, %v514_v24  ;;  %v3099_v24 = vld [vmem:[#allocation2 + $0x158] sm:$0xff]   ;;  %v3109_v32 = vld [vmem:[#allocation2 + $0x1a0] sm:$0xff]  }
 0x280   :  { %v529_v35 = vpack.c.bf16 %v528_v34, %v527_v33  ;;  %v3111_v33 = vld [vmem:[#allocation2 + $0x198] sm:$0xff]   ;;  %v3113_v34 = vld [vmem:[#allocation2 + $0x190] sm:$0xff]  }
 0x282   :  { %2758 = vmatmul.mubr.bf16.vlgmr.msra.gmra.mxu1 %v529_v35  ;;  %v3115_v35 = vld [vmem:[#allocation2 + $0x188] sm:$0xff]  }
 0x283   :  { %2803 = vmatprep.mubr.msk.bf16.mxu1 %vm3303_vm0, %v3302_v1  ;;  %2788 = vmatpush3.bf16.msra.mxu1 %v3079_v36 }
 0x284   :  { %2789 = vmatprep.subr.bf16.mxu1 %v3302_v1 }
 0x287   :  { %2790 = vmatpush3.bf16.msra.mxu1 %v3080_v37  ;;  %v2412_v37 = vld [vmem:[%s3686_s5 + $0x3] ss:$0 sm:$0xff] }
 0x288   :  { %2791 = vmatprep.subr.bf16.mxu1 %v3302_v1 }
 0x28b   :  { %2792 = vmatpush3.bf16.msra.mxu1 %v3082_v38 }
 0x28c   :  { %2793 = vmatprep.subr.bf16.mxu1 %v3302_v1 }
 0x28f   :  { %2794 = vmatpush3.bf16.msra.mxu1 %v3084_v39 }
 0x290   :  { %2795 = vmatprep.subr.bf16.mxu1 %v3302_v1 }
 0x293   :  { %2796 = vmatpush3.bf16.msra.mxu1 %v3086_v40 }
 0x294   :  { %2797 = vmatprep.subr.bf16.mxu1 %v3302_v1 }
 0x297   :  { %2798 = vmatpush3.bf16.msra.mxu1 %v3088_v41 }
 0x298   :  { %2799 = vmatprep.subr.bf16.mxu1 %v3302_v1 }
 0x29b   :  { %2800 = vmatpush3.bf16.msra.mxu1 %v3090_v42 }
 0x29c   :  { %2801 = vmatprep.subr.bf16.mxu1 %v3302_v1 }
 0x29f   :  { %2802 = vmatpush3.bf16.msra.mxu1 %v3092_v43 }
 0x2a0   :  { %2827 = vmatprep.subr.bf16.mxu1 %v3302_v1 }
 0x2a2   :  { %2804 = vmatmul.mubr.bf16.vlgmr.msra.gmra.mxu1 %v3395_v16 }
 0x2a3   :  { %2843 = vmatprep.mubr.msk.bf16.mxu1 %vm3303_vm0, %v3302_v1  ;;  %2828 = vmatpush3.bf16.msra.mxu1 %v3103_v28  ;;  %v2442_v28 = vld [vmem:[%s3686_s5 + $0x8] ss:$0 sm:$0xff] }
 0x2a4   :  { %2829 = vmatprep.subr.bf16.mxu1 %v3302_v1 }
 0x2a7   :  { %2830 = vmatpush3.bf16.msra.mxu1 %v3105_v30 }
 0x2a8   :  { %2831 = vmatprep.subr.bf16.mxu1 %v3302_v1 }
 0x2ab   :  { %2832 = vmatpush3.bf16.msra.mxu1 %v3107_v31  ;;  %v1358_v31 = vmul.f32 %v2442_v28, %v3445_v5 }
 0x2ac   :  { %2833 = vmatprep.subr.bf16.mxu1 %v3302_v1 }
 0x2af   :  { %2834 = vmatpush3.bf16.msra.mxu1 %v3109_v32 }
 0x2b0   :  { %2835 = vmatprep.subr.bf16.mxu1 %v3302_v1 }
 0x2b3   :  { %2836 = vmatpush3.bf16.msra.mxu1 %v3111_v33  ;;  %v2444_v33 = vld [vmem:[%s3686_s5 + $0x9] ss:$0 sm:$0xff] }
 0x2b4   :  { %2837 = vmatprep.subr.bf16.mxu1 %v3302_v1 }
 0x2b7   :  { %2838 = vmatpush3.bf16.msra.mxu1 %v3113_v34 }
 0x2b8   :  { %2839 = vmatprep.subr.bf16.mxu1 %v3302_v1 }
 0x2bb   :  { %2840 = vmatpush3.bf16.msra.mxu1 %v3115_v35 }
 0x2bc   :  { %2841 = vmatprep.subr.bf16.mxu1 %v3302_v1 }
 0x342   :  { %v634_v45 = vpop.f32.mrf.mxu1 }
 0x343   :  { %v635_v46 = vadd.f32 %v2384_v44, %v634_v45 }
 0x344   :  { %v2759_v47 = vpop.f32.mrf.mxu1 }
 0x345   :  { %v2393_v48 = vmul.f32 -1.442695, %v635_v46 }
 0x346   :  { %v637_v49 = vpop.f32.mrf.mxu1 }
 0x347   :  { %3191 = vpow2.f32 %v2393_v48  ;;  %v638_v50 = vadd.f32 %v2384_v44, %v637_v49  ;;  %v3104_v48 = vld [vmem:[#allocation2 + $0x1f8] sm:$0xff]  }
 0x348   :  { %v2760_v51 = vpop.f32.mrf.mxu1 }
 0x349   :  { %v2394_v52 = vmul.f32 -1.442695, %v638_v50  ;;  %v3108_v51 = vld [vmem:[#allocation2 + $0x1e8] sm:$0xff]  }
 0x34b   :  { %3193 = vpow2.f32 %v2394_v52  ;;  %v3110_v52 = vld [vmem:[#allocation2 + $0x1e0] sm:$0xff]  }
 0x354   :  { %v3192_v53 = vpop.eup %3191 }
 0x355   :  { %v647_v54 = vadd.f32 1.0, %v3192_v53  ;;  %v3112_v53 = vld [vmem:[#allocation2 + $0x1d8] sm:$0xff]  }
 0x357   :  { %3195 = vrcp.f32 %v647_v54  ;;  %v3114_v54 = vld [vmem:[#allocation2 + $0x1d0] sm:$0xff]  }
 0x358   :  { %v3194_v16 = vpop.eup %3193 }
 0x359   :  { %v648_v55 = vadd.f32 1.0, %v3194_v16  ;;  %v3116_v16 = vld [vmem:[#allocation2 + $0x1c8] sm:$0xff]  }
 0x35b   :  { %3197 = vrcp.f32 %v648_v55  ;;  %v3117_v55 = vld [vmem:[#allocation2 + $0x180] sm:$0xff]  }
 0x35c   :  { %2842 = vmatpush3.bf16.msra.mxu1 %v3117_v55  ;;  %v3131_v55 = vld [vmem:[#allocation2 + $0x258] sm:$0xff]  }
 0x35d   :  { %2867 = vmatprep.subr.bf16.mxu1 %v3302_v1 }
 0x362   :  { %v921_v8 = vpop.f32.mrf.mxu1 }
 0x364   :  { %v3196_v56 = vpop.eup %3195  ;;  %v2805_v9 = vpop.f32.mrf.mxu1 }
 0x365   :  { %v653_v58 = vmul.f32 %v3196_v56, %v635_v46  ;;  %v3118_v56 = vld [vmem:[#allocation2 + $0x1c0] sm:$0xff]  }
 0x366   :  { %v924_v10 = vpop.f32.mrf.mxu1 }
 0x368   :  { %v3198_v57 = vpop.eup %3197  ;;  %v2806_v12 = vpop.f32.mrf.mxu1 }
 0x369   :  { %v654_v59 = vmul.f32 %v3198_v57, %v638_v50  ;;  %v3106_v50 = vld [vmem:[#allocation2 + $0x1f0] sm:$0xff]   ;;  %v2414_v57 = vld [vmem:[%s3686_s5 + $0x4] ss:$0 sm:$0xff] }
 0x36b   :  { %v655_v60 = vpack.c.bf16 %v654_v59, %v653_v58 }
 0x36d   :  { %2762 = vmatpush3.bf16.msra.mxu0 %v655_v60 }
 0x36e   :  { %2767 = vmatprep.subr.bf16.mxu0 %v3302_v1 }
 0x370   :  { %2764 = vmatmul.mubr.msk.bf16.vlgmr.msra.gmra.mxu0 %vm672_vm8, %v3473_v61 }
 0x371   :  { %2768 = vmatpush3.bf16.msra.mxu0 %v3081_v62  ;;  %2783 = vmatprep.mubr.msk.bf16.mxu0 %vm3303_vm0, %v3302_v1 }
 0x372   :  { %2769 = vmatprep.subr.bf16.mxu0 %v3302_v1 }
 0x375   :  { %2770 = vmatpush3.bf16.msra.mxu0 %v3083_v63 }
 0x376   :  { %2771 = vmatprep.subr.bf16.mxu0 %v3302_v1 }
 0x379   :  { %2772 = vmatpush3.bf16.msra.mxu0 %v3085_v0 }
 0x37a   :  { %2773 = vmatprep.subr.bf16.mxu0 %v3302_v1 }
 0x37d   :  { %2774 = vmatpush3.bf16.msra.mxu0 %v3087_v2 }
 0x37e   :  { %2775 = vmatprep.subr.bf16.mxu0 %v3302_v1 }
 0x381   :  { %2776 = vmatpush3.bf16.msra.mxu0 %v3089_v3 }
 0x382   :  { %2777 = vmatprep.subr.bf16.mxu0 %v3302_v1 }
 0x385   :  { %2778 = vmatpush3.bf16.msra.mxu0 %v3091_v4 }
 0x386   :  { %2779 = vmatprep.subr.bf16.mxu0 %v3302_v1 }
 0x389   :  { %2780 = vmatpush3.bf16.msra.mxu0 %v3093_v6 }
 0x38a   :  { %2781 = vmatprep.subr.bf16.mxu0 %v3302_v1 }
 0x38d   :  { %2782 = vmatpush3.bf16.msra.mxu0 %v3094_v7 }
 0x38e   :  { %2807 = vmatprep.subr.bf16.mxu0 %v3302_v1 }
 0x430   :  { %v710_v13 = vpop.f32.mrf.mxu0 }
 0x431   :  { %v733_v14 = vpack.c.bf16 %v710_v13, %v710_v13 }
 0x432   :  { %v2765_v15 = vpop.f32.mrf.mxu0 }
 0x433   :  { %2784 = vmatmul.mubr.bf16.vlgmr.msra.gmra.mxu0 %v733_v14 }
 0x434   :  { %v713_v17 = vpop.f32.mrf.mxu0  ;;  %2823 = vmatprep.mubr.msk.bf16.mxu0 %vm3303_vm0, %v3302_v1  ;;  %2808 = vmatpush3.bf16.msra.mxu0 %v3095_v19  ;;  %v3122_v19 = vld [vmem:[#allocation2 + $0x220] sm:$0xff]  }
 0x435   :  { %2809 = vmatprep.subr.bf16.mxu0 %v3302_v1  ;;  %v3119_v17 = vld [vmem:[#allocation2 + $0x238] sm:$0xff]  }
 0x436   :  { %v2766_v18 = vpop.f32.mrf.mxu0 }
 0x437   :  { %v3120_v18 = vld [vmem:[#allocation2 + $0x230] sm:$0xff]  }
 0x438   :  { %2810 = vmatpush3.bf16.msra.mxu0 %v3096_v20  ;;  %v3124_v20 = vld [vmem:[#allocation2 + $0x210] sm:$0xff]  }
 0x439   :  { %2811 = vmatprep.subr.bf16.mxu0 %v3302_v1 }
 0x43c   :  { %2812 = vmatpush3.bf16.msra.mxu0 %v3097_v21  ;;  %v3125_v21 = vld [vmem:[#allocation2 + $0x208] sm:$0xff]  }
 0x43d   :  { %2813 = vmatprep.subr.bf16.mxu0 %v3302_v1 }
 0x440   :  { %2814 = vmatpush3.bf16.msra.mxu0 %v3098_v22  ;;  %v3126_v22 = vld [vmem:[#allocation2 + $0x200] sm:$0xff]  }
 0x441   :  { %2815 = vmatprep.subr.bf16.mxu0 %v3302_v1 }
 0x444   :  { %2816 = vmatpush3.bf16.msra.mxu0 %v3099_v24 }
 0x445   :  { %2817 = vmatprep.subr.bf16.mxu0 %v3302_v1 }
 0x448   :  { %2818 = vmatpush3.bf16.msra.mxu0 %v3100_v25 }
 0x449   :  { %2819 = vmatprep.subr.bf16.mxu0 %v3302_v1 }
 0x44c   :  { %2820 = vmatpush3.bf16.msra.mxu0 %v3101_v26 }
 0x44d   :  { %2821 = vmatprep.subr.bf16.mxu0 %v3302_v1 }
 0x450   :  { %2822 = vmatpush3.bf16.msra.mxu0 %v3102_v27 }
 0x451   :  { %2847 = vmatprep.subr.bf16.mxu0 %v3302_v1 }
 0x4f3   :  { %v833_v36 = vpop.f32.mrf.mxu0 }
 0x4f4   :  { %v922_v38 = vadd.f32 %v921_v8, %v833_v36 }
 0x4f5   :  { %v2785_v39 = vpop.f32.mrf.mxu0 }
 0x4f6   :  { %v932_v40 = vadd.f32 %v2412_v37, %v922_v38  ;;  %v1359_v37 = vmul.f32 %v2442_v28, %v3451_v11  ;;  %v3127_v11 = vld [vmem:[#allocation2 + $0x278] sm:$0xff]  }
 0x4f7   :  { %v836_v41 = vpop.f32.mrf.mxu0 }
 0x4f8   :  { %v2413_v42 = vmul.f32 -1.442695, %v932_v40 }
 0x4f9   :  { %v2786_v43 = vpop.f32.mrf.mxu0 }
 0x4fa   :  { %3199 = vpow2.f32 %v2413_v42 }
 0x507   :  { %v3200_v44 = vpop.eup %3199 }
 0x508   :  { %v936_v45 = vadd.f32 1.0, %v3200_v44 }
 0x50a   :  { %3201 = vrcp.f32 %v936_v45 }
 0x517   :  { %v3202_v46 = vpop.eup %3201 }
 0x518   :  { %v939_v47 = vmul.f32 %v3202_v46, %v932_v40 }
 0x51a   :  { %v940_v49 = vpack.c.bf16 %v939_v47, %v939_v47 }
 0x51c   :  { %2824 = vmatmul.mubr.bf16.vlgmr.msra.gmra.mxu0 %v940_v49 }
 0x51d   :  { %2848 = vmatpush3.bf16.msra.mxu0 %v3104_v48  ;;  %2863 = vmatprep.mubr.msk.bf16.mxu0 %vm3303_vm0, %v3302_v1 }
 0x51e   :  { %2849 = vmatprep.subr.bf16.mxu0 %v3302_v1 }
 0x521   :  { %2850 = vmatpush3.bf16.msra.mxu0 %v3106_v50 }
 0x522   :  { %2851 = vmatprep.subr.bf16.mxu0 %v3302_v1 }
 0x525   :  { %2852 = vmatpush3.bf16.msra.mxu0 %v3108_v51 }
 0x526   :  { %2853 = vmatprep.subr.bf16.mxu0 %v3302_v1 }
 0x529   :  { %2854 = vmatpush3.bf16.msra.mxu0 %v3110_v52 }
 0x52a   :  { %2855 = vmatprep.subr.bf16.mxu0 %v3302_v1 }
 0x52d   :  { %2856 = vmatpush3.bf16.msra.mxu0 %v3112_v53  ;;  %v3128_v53 = vld [vmem:[#allocation2 + $0x270] sm:$0xff]  }
 0x52e   :  { %2857 = vmatprep.subr.bf16.mxu0 %v3302_v1 }
 0x531   :  { %2858 = vmatpush3.bf16.msra.mxu0 %v3114_v54  ;;  %v3129_v54 = vld [vmem:[#allocation2 + $0x268] sm:$0xff]  }
 0x532   :  { %2859 = vmatprep.subr.bf16.mxu0 %v3302_v1 }
 0x535   :  { %2860 = vmatpush3.bf16.msra.mxu0 %v3116_v16  ;;  %v3130_v16 = vld [vmem:[#allocation2 + $0x260] sm:$0xff]  }
 0x536   :  { %2861 = vmatprep.subr.bf16.mxu0 %v3302_v1 }
 0x539   :  { %2862 = vmatpush3.bf16.msra.mxu0 %v3118_v56  ;;  %v3132_v56 = vld [vmem:[#allocation2 + $0x250] sm:$0xff]  }
 0x53a   :  { %2879 = vmatprep.subr.bf16.mxu0 %v3302_v1 }
 0x5dc   :  { %v1045_v58 = vpop.f32.mrf.mxu0 }
 0x5dd   :  { %v1046_v59 = vadd.f32 %v2414_v57, %v1045_v58  ;;  %v3133_v57 = vld [vmem:[#allocation2 + $0x248] sm:$0xff]   ;;  %v3134_v58 = vld [vmem:[#allocation2 + $0x240] sm:$0xff]  }
 0x5de   :  { %v2825_v60 = vpop.f32.mrf.mxu0 }
 0x5df   :  { %v3522_v62 = vpack.c.bf16 %v1046_v59, %v1046_v59  ;;  %v2448_v59 = vld [vmem:[%s3686_s5 + $0xa] ss:$0 sm:$0xff] }
 0x5e0   :  { %v1048_v63 = vpop.f32.mrf.mxu0 }
 0x5e1   :  { %2844 = vmatmul.mubr.bf16.vlgmr.msra.gmra.mxu1 %v3522_v62  ;;  %2864 = vmatmul.mubr.bf16.vlgmr.msra.gmra.mxu0 %v3522_v62 }
 0x5e2   :  { %v2826_v0 = vpop.f32.mrf.mxu0  ;;  %2869 = vmatprep.mubr.msk.bf16.mxu1 %vm3303_vm0, %v3302_v1  ;;  %2895 = vmatprep.mubr.msk.bf16.mxu0 %vm3303_vm0, %v3302_v1 }
 0x5e3   :  { %2880 = vmatpush3.bf16.msra.mxu0 %v3119_v17 }
 0x5e4   :  { %2881 = vmatprep.subr.bf16.mxu0 %v3302_v1 }
 0x5e7   :  { %2882 = vmatpush3.bf16.msra.mxu0 %v3120_v18 }
 0x5e8   :  { %2883 = vmatprep.subr.bf16.mxu0 %v3302_v1 }
 0x6a1   :  { %v1151_v2 = vpop.f32.mrf.mxu1  ;;  %v1257_v3 = vpop.f32.mrf.mxu0 }
 0x6a2   :  { %v1263_v4 = vpack.c.bf16 %v1257_v3, %v1257_v3  ;;  %v1157_v8 = vpack.c.bf16 %v1151_v2, %v1151_v2 }
 0x6a3   :  { %v2845_v6 = vpop.f32.mrf.mxu1  ;;  %v2865_v7 = vpop.f32.mrf.mxu0 }
 0x6a4   :  { %v1265_v9 = vsel %vm407_vm7, %v1263_v4, 0  ;;  %v1309_v15 = vsel %vm407_vm7, %v1157_v8, 0 }
 0x6a5   :  { %v1154_v10 = vpop.f32.mrf.mxu1  ;;  %v1260_v12 = vpop.f32.mrf.mxu0  ;;  %2868 = vmatpush3.bf16.msra.mxu1 %v1265_v9 }
 0x6a6   :  { %2873 = vmatprep.subr.bf16.mxu1 %v3302_v1 }
 0x6a7   :  { %v2846_v13 = vpop.f32.mrf.mxu1  ;;  %v2866_v14 = vpop.f32.mrf.mxu0 }
 0x6a8   :  { %2870 = vmatmul.mubr.msk.bf16.vlgmr.msra.gmra.mxu1 %vm99_vm5, %v3407_v29  ;;  %v3121_v29 = vld [vmem:[#allocation2 + $0x228] sm:$0xff]  }
 0x6a9   :  { %2874 = vmatpush3.bf16.msra.mxu1 %v1309_v15  ;;  %2875 = vmatprep.mubr.msk.bf16.mxu1 %vm3303_vm0, %v3302_v1 }
 0x6aa   :  { %2899 = vmatprep.subr.bf16.mxu1 %v3302_v1  ;;  %2884 = vmatpush3.bf16.msra.mxu0 %v3121_v29 }
 0x6ab   :  { %2885 = vmatprep.subr.bf16.mxu0 %v3302_v1 }
 0x6ae   :  { %2886 = vmatpush3.bf16.msra.mxu0 %v3122_v19 }
 0x6af   :  { %2887 = vmatprep.subr.bf16.mxu0 %v3302_v1 }
 0x6b0   :  { %2876 = vmatmul.mubr.msk.bf16.vlgmr.msra.gmra.mxu1 %vm99_vm5, %v3403_v23  ;;  %v3123_v23 = vld [vmem:[#allocation2 + $0x218] sm:$0xff]  }
 0x6b1   :  { %2901 = vmatprep.mubr.msk.bf16.mxu1 %vm3303_vm0, %v3302_v1 }
 0x6b2   :  { %2888 = vmatpush3.bf16.msra.mxu0 %v3123_v23 }
 0x6b3   :  { %2889 = vmatprep.subr.bf16.mxu0 %v3302_v1 }
 0x6b6   :  { %2890 = vmatpush3.bf16.msra.mxu0 %v3124_v20  ;;  %v3135_v20 = vld [vmem:[#allocation2 + $0x2b8] sm:$0xff]  }
 0x6b7   :  { %2891 = vmatprep.subr.bf16.mxu0 %v3302_v1 }
 0x6ba   :  { %2892 = vmatpush3.bf16.msra.mxu0 %v3125_v21  ;;  %v3136_v21 = vld [vmem:[#allocation2 + $0x2b0] sm:$0xff]  }
 0x6bb   :  { %2893 = vmatprep.subr.bf16.mxu0 %v3302_v1 }
 0x6be   :  { %2894 = vmatpush3.bf16.msra.mxu0 %v3126_v22  ;;  %v3137_v22 = vld [vmem:[#allocation2 + $0x2a8] sm:$0xff]  }
 0x6bf   :  { %2925 = vmatprep.subr.bf16.mxu0 %v3302_v1 }
 0x768   :  { %v1301_v24 = vpop.f32.mrf.mxu1 }
 0x76a   :  { %v2871_v25 = vpop.f32.mrf.mxu1 }
 0x76b   :  { %v3139_v25 = vld [vmem:[#allocation2 + $0x298] sm:$0xff]  }
 0x76c   :  { %v1304_v26 = vpop.f32.mrf.mxu1 }
 0x76e   :  { %v2872_v27 = vpop.f32.mrf.mxu1 }
 0x76f   :  { %v3142_v27 = vld [vmem:[#allocation2 + $0x280] sm:$0xff]  }
 0x770   :  { %v1345_v30 = vpop.f32.mrf.mxu1 }
 0x771   :  { %v1346_v32 = vadd.f32 %v1345_v30, %v1301_v24  ;;  %v3138_v24 = vld [vmem:[#allocation2 + $0x2a0] sm:$0xff]  }
 0x772   :  { %v2877_v34 = vpop.f32.mrf.mxu1 }
 0x773   :  { %v1360_v35 = vadd.f32 %v1358_v31, %v1346_v32  ;;  %v3143_v34 = vld [vmem:[#allocation2 + $0x2f8] sm:$0xff]  }
 0x774   :  { %v1348_v36 = vpop.f32.mrf.mxu1 }
 0x775   :  { %v1367_v38 = vadd.f32 %v2444_v33, %v1360_v35  ;;  %v1349_v39 = vadd.f32 %v1348_v36, %v1304_v26  ;;  %v3141_v26 = vld [vmem:[#allocation2 + $0x288] sm:$0xff]   ;;  %v3144_v35 = vld [vmem:[#allocation2 + $0x2f0] sm:$0xff]  }
 0x776   :  { %v2878_v40 = vpop.f32.mrf.mxu1  ;;  %v3145_v36 = vld [vmem:[#allocation2 + $0x2e8] sm:$0xff]  }
 0x777   :  { %v2445_v41 = vmul.f32 -1.442695, %v1367_v38  ;;  %v1361_v42 = vadd.f32 %v1359_v37, %v1349_v39  ;;  %v3146_v37 = vld [vmem:[#allocation2 + $0x2e0] sm:$0xff]   ;;  %v3148_v39 = vld [vmem:[#allocation2 + $0x2d0] sm:$0xff]   ;;  %v3149_v40 = vld [vmem:[#allocation2 + $0x2c8] sm:$0xff]  }
 0x779   :  { %3203 = vpow2.f32 %v2445_v41  ;;  %v1368_v43 = vadd.f32 %v2444_v33, %v1361_v42  ;;  %v3150_v41 = vld [vmem:[#allocation2 + $0x2c0] sm:$0xff]   ;;  %v3151_v42 = vld [vmem:[#allocation5 + $0x38] sm:$0xff]  }
 0x77b   :  { %v2446_v44 = vmul.f32 -1.442695, %v1368_v43 }
 0x77d   :  { %3205 = vpow2.f32 %v2446_v44  ;;  %v3153_v44 = vld [vmem:[#allocation5 + $0x28] sm:$0xff]  }
 0x786   :  { %v3204_v5 = vpop.eup %3203 }
 0x787   :  { %v1375_v45 = vadd.f32 1.0, %v3204_v5  ;;  %v3154_v5 = vld [vmem:[#allocation5 + $0x20] sm:$0xff]  }
 0x789   :  { %3207 = vrcp.f32 %v1375_v45  ;;  %v3155_v45 = vld [vmem:[#allocation5 + $0x18] sm:$0xff]  }
 0x78a   :  { %v3206_v46 = vpop.eup %3205 }
 0x78b   :  { %v1376_v47 = vadd.f32 1.0, %v3206_v46  ;;  %v3156_v46 = vld [vmem:[#allocation5 + $0x10] sm:$0xff]  }
 0x78d   :  { %3209 = vrcp.f32 %v1376_v47  ;;  %v3157_v47 = vld [vmem:[#allocation5 + $0x8] sm:$0xff]  }
 0x796   :  { %v3208_v48 = vpop.eup %3207 }
 0x797   :  { %v1381_v50 = vmul.f32 %v3208_v48, %v1367_v38  ;;  %v3147_v38 = vld [vmem:[#allocation2 + $0x2d8] sm:$0xff]  }
 0x79a   :  { %v3210_v49 = vpop.eup %3209 }
 0x79b   :  { %v1382_v51 = vmul.f32 %v3210_v49, %v1368_v43  ;;  %v3152_v43 = vld [vmem:[#allocation5 + $0x30] sm:$0xff]   ;;  %v2477_v49 = vld [vmem:[%s3686_s5 + $0xb] ss:$0 sm:$0xff] }
 0x79d   :  { %v1383_v52 = vpack.c.bf16 %v1382_v51, %v1381_v50 }
 0x79f   :  { %2896 = vmatmul.mubr.bf16.vlgmr.msra.gmra.mxu0 %v1383_v52 }
 0x7a0   :  { %2926 = vmatpush3.bf16.msra.mxu0 %v3127_v11  ;;  %2941 = vmatprep.mubr.msk.bf16.mxu0 %vm3303_vm0, %v3302_v1 }
 0x7a1   :  { %2927 = vmatprep.subr.bf16.mxu0 %v3302_v1 }
 0x7a4   :  { %2928 = vmatpush3.bf16.msra.mxu0 %v3128_v53 }
 0x7a5   :  { %2929 = vmatprep.subr.bf16.mxu0 %v3302_v1 }
 0x7a8   :  { %2930 = vmatpush3.bf16.msra.mxu0 %v3129_v54 }
 0x7a9   :  { %2931 = vmatprep.subr.bf16.mxu0 %v3302_v1 }
 0x7ac   :  { %2932 = vmatpush3.bf16.msra.mxu0 %v3130_v16 }
 0x7ad   :  { %2933 = vmatprep.subr.bf16.mxu0 %v3302_v1 }
 0x7b0   :  { %2934 = vmatpush3.bf16.msra.mxu0 %v3131_v55 }
 0x7b1   :  { %2935 = vmatprep.subr.bf16.mxu0 %v3302_v1 }
 0x7b4   :  { %2936 = vmatpush3.bf16.msra.mxu0 %v3132_v56 }
 0x7b5   :  { %2937 = vmatprep.subr.bf16.mxu0 %v3302_v1 }
 0x7b8   :  { %2938 = vmatpush3.bf16.msra.mxu0 %v3133_v57 }
 0x7b9   :  { %2939 = vmatprep.subr.bf16.mxu0 %v3302_v1 }
 0x7bc   :  { %2940 = vmatpush3.bf16.msra.mxu0 %v3134_v58 }
 0x7bd   :  { %2965 = vmatprep.subr.bf16.mxu0 %v3302_v1 }
 0x7bf   :  { %2942 = vmatmul.mubr.bf16.vlgmr.msra.gmra.mxu0 %v3522_v62 }
 0x7c0   :  { %2981 = vmatprep.mubr.msk.bf16.mxu0 %vm3303_vm0, %v3302_v1  ;;  %2966 = vmatpush3.bf16.msra.mxu0 %v3151_v42 }
 0x7c1   :  { %2967 = vmatprep.subr.bf16.mxu0 %v3302_v1 }
 0x7c4   :  { %2968 = vmatpush3.bf16.msra.mxu0 %v3152_v43 }
 0x7c5   :  { %2969 = vmatprep.subr.bf16.mxu0 %v3302_v1 }
 0x7c8   :  { %2970 = vmatpush3.bf16.msra.mxu0 %v3153_v44 }
 0x7c9   :  { %2971 = vmatprep.subr.bf16.mxu0 %v3302_v1 }
 0x7cc   :  { %2972 = vmatpush3.bf16.msra.mxu0 %v3154_v5 }
 0x7cd   :  { %2973 = vmatprep.subr.bf16.mxu0 %v3302_v1 }
 0x7d0   :  { %2974 = vmatpush3.bf16.msra.mxu0 %v3155_v45 }
 0x7d1   :  { %2975 = vmatprep.subr.bf16.mxu0 %v3302_v1 }
 0x7d4   :  { %2976 = vmatpush3.bf16.msra.mxu0 %v3156_v46 }
 0x7d5   :  { %2977 = vmatprep.subr.bf16.mxu0 %v3302_v1 }
 0x7d8   :  { %2978 = vmatpush3.bf16.msra.mxu0 %v3157_v47  ;;  %v3175_v47 = vld [vmem:[%s3689_s8 + $0x38] sm:$0xff]  }
 0x7d9   :  { %2979 = vmatprep.subr.bf16.mxu0 %v3302_v1 }
 0x85f   :  { %v1488_v60 = vpop.f32.mrf.mxu0 }
 0x860   :  { %v1489_v63 = vadd.f32 %v2448_v59, %v1488_v60  ;;  %v2480_v60 = vld [vmem:[%s3686_s5 + $0xc] ss:$0 sm:$0xff] }
 0x861   :  { %v2897_v0 = vpop.f32.mrf.mxu0 }
 0x862   :  { %v2457_v2 = vmul.f32 -1.442695, %v1489_v63 }
 0x863   :  { %v1491_v3 = vpop.f32.mrf.mxu0 }
 0x864   :  { %3211 = vpow2.f32 %v2457_v2  ;;  %v1492_v4 = vadd.f32 %v2448_v59, %v1491_v3  ;;  %v3158_v59 = vld [vmem:[#allocation5] sm:$0xff]  }
 0x865   :  { %v2898_v6 = vpop.f32.mrf.mxu0  ;;  %2980 = vmatpush3.bf16.msra.mxu0 %v3158_v59 }
 0x866   :  { %v2458_v7 = vmul.f32 -1.442695, %v1492_v4  ;;  %3005 = vmatprep.subr.bf16.mxu0 %v3302_v1 }
 0x868   :  { %3213 = vpow2.f32 %v2458_v7  ;;  %v3159_v7 = vld [vmem:[#allocation5 + $0x78] sm:$0xff]  }
 0x871   :  { %v3212_v8 = vpop.eup %3211 }
 0x872   :  { %v1501_v9 = vadd.f32 1.0, %v3212_v8  ;;  %v3160_v8 = vld [vmem:[#allocation5 + $0x70] sm:$0xff]  }
 0x874   :  { %3215 = vrcp.f32 %v1501_v9  ;;  %v3161_v9 = vld [vmem:[#allocation5 + $0x68] sm:$0xff]  }
 0x875   :  { %v3214_v62 = vpop.eup %3213 }
 0x876   :  { %v1502_v10 = vadd.f32 1.0, %v3214_v62  ;;  %v3162_v62 = vld [vmem:[#allocation5 + $0x60] sm:$0xff]  }
 0x878   :  { %3217 = vrcp.f32 %v1502_v10  ;;  %v3163_v10 = vld [vmem:[#allocation5 + $0x58] sm:$0xff]  }
 0x87f   :  { %v3574_v12 = vpop.f32.mrf.mxu0 }
 0x881   :  { %v2943_v13 = vpop.f32.mrf.mxu0  ;;  %v3216_v14 = vpop.eup %3215 }
 0x882   :  { %v1507_v29 = vmul.f32 %v3216_v14, %v1489_v63  ;;  %v3165_v13 = vld [vmem:[#allocation5 + $0x48] sm:$0xff]   ;;  %v3166_v14 = vld [vmem:[#allocation5 + $0x40] sm:$0xff]  }
 0x883   :  { %v1758_v15 = vpop.f32.mrf.mxu0 }
 0x884   :  { %v3167_v15 = vld [vmem:[#allocation5 + $0xb8] sm:$0xff]  }
 0x885   :  { %v3218_v17 = vpop.eup %3217  ;;  %v2944_v18 = vpop.f32.mrf.mxu0 }
 0x886   :  { %v1508_v19 = vmul.f32 %v3218_v17, %v1492_v4  ;;  %v3168_v17 = vld [vmem:[#allocation5 + $0xb0] sm:$0xff]   ;;  %v3169_v18 = vld [vmem:[#allocation5 + $0xa8] sm:$0xff]  }
 0x888   :  { %v1509_v23 = vpack.c.bf16 %v1508_v19, %v1507_v29  ;;  %v3170_v29 = vld [vmem:[#allocation5 + $0xa0] sm:$0xff]  }
 0x889   :  { %v2489_v19 = vld [vmem:[%s3688_s7] ss:$0 sm:$0xff] }
 0x88a   :  { %2900 = vmatpush3.bf16.msra.mxu1 %v1509_v23 }
 0x88b   :  { %2905 = vmatprep.subr.bf16.mxu1 %v3302_v1 }
 0x88d   :  { %2902 = vmatmul.mubr.msk.bf16.vlgmr.msra.gmra.mxu1 %vm672_vm8, %v3473_v61  ;;  %v3140_v61 = vld [vmem:[#allocation2 + $0x290] sm:$0xff]  }
 0x88e   :  { %2906 = vmatpush3.bf16.msra.mxu1 %v3135_v20  ;;  %2921 = vmatprep.mubr.msk.bf16.mxu1 %vm3303_vm0, %v3302_v1 }
 0x88f   :  { %2907 = vmatprep.subr.bf16.mxu1 %v3302_v1 }
 0x892   :  { %2908 = vmatpush3.bf16.msra.mxu1 %v3136_v21 }
 0x893   :  { %2909 = vmatprep.subr.bf16.mxu1 %v3302_v1 }
 0x896   :  { %2910 = vmatpush3.bf16.msra.mxu1 %v3137_v22 }
 0x897   :  { %2911 = vmatprep.subr.bf16.mxu1 %v3302_v1 }
 0x89a   :  { %2912 = vmatpush3.bf16.msra.mxu1 %v3138_v24 }
 0x89b   :  { %2913 = vmatprep.subr.bf16.mxu1 %v3302_v1 }
 0x89e   :  { %2914 = vmatpush3.bf16.msra.mxu1 %v3139_v25 }
 0x89f   :  { %2915 = vmatprep.subr.bf16.mxu1 %v3302_v1 }
 0x8a2   :  { %2916 = vmatpush3.bf16.msra.mxu1 %v3140_v61 }
 0x8a3   :  { %2917 = vmatprep.subr.bf16.mxu1 %v3302_v1 }
 0x8a6   :  { %2918 = vmatpush3.bf16.msra.mxu1 %v3141_v26 }
 0x8a7   :  { %2919 = vmatprep.subr.bf16.mxu1 %v3302_v1 }
 0x8aa   :  { %2920 = vmatpush3.bf16.msra.mxu1 %v3142_v27 }
 0x8ab   :  { %2945 = vmatprep.subr.bf16.mxu1 %v3302_v1 }
 0x94d   :  { %v1544_v28 = vpop.f32.mrf.mxu1 }
 0x94e   :  { %v1567_v30 = vpack.c.bf16 %v1544_v28, %v1544_v28 }
 0x94f   :  { %v2903_v31 = vpop.f32.mrf.mxu1 }
 0x950   :  { %2922 = vmatmul.mubr.bf16.vlgmr.msra.gmra.mxu1 %v1567_v30  ;;  %v3171_v31 = vld [vmem:[#allocation5 + $0x98] sm:$0xff]  }
 0x951   :  { %v1547_v32 = vpop.f32.mrf.mxu1  ;;  %2961 = vmatprep.mubr.msk.bf16.mxu1 %vm3303_vm0, %v3302_v1  ;;  %2946 = vmatpush3.bf16.msra.mxu1 %v3143_v34  ;;  %v3174_v34 = vld [vmem:[#allocation5 + $0x80] sm:$0xff]  }
 0x952   :  { %2947 = vmatprep.subr.bf16.mxu1 %v3302_v1  ;;  %v3172_v32 = vld [vmem:[#allocation5 + $0x90] sm:$0xff]  }
 0x953   :  { %v2904_v33 = vpop.f32.mrf.mxu1 }
 0x954   :  { %v3173_v33 = vld [vmem:[#allocation5 + $0x88] sm:$0xff]  }
 0x955   :  { %2948 = vmatpush3.bf16.msra.mxu1 %v3144_v35  ;;  %v2499_v35 = vld [vmem:[%s3688_s7 + $0x1] ss:$0 sm:$0xff] }
 0x956   :  { %2949 = vmatprep.subr.bf16.mxu1 %v3302_v1 }
 0x959   :  { %2950 = vmatpush3.bf16.msra.mxu1 %v3145_v36 }
 0x95a   :  { %2951 = vmatprep.subr.bf16.mxu1 %v3302_v1 }
 0x95d   :  { %2952 = vmatpush3.bf16.msra.mxu1 %v3146_v37 }
 0x95e   :  { %2953 = vmatprep.subr.bf16.mxu1 %v3302_v1 }
 0x961   :  { %2954 = vmatpush3.bf16.msra.mxu1 %v3147_v38 }
 0x962   :  { %2955 = vmatprep.subr.bf16.mxu1 %v3302_v1 }
 0x965   :  { %2956 = vmatpush3.bf16.msra.mxu1 %v3148_v39 }
 0x966   :  { %2957 = vmatprep.subr.bf16.mxu1 %v3302_v1 }
 0x969   :  { %2958 = vmatpush3.bf16.msra.mxu1 %v3149_v40 }
 0x96a   :  { %2959 = vmatprep.subr.bf16.mxu1 %v3302_v1 }
 0x96d   :  { %2960 = vmatpush3.bf16.msra.mxu1 %v3150_v41 }
 0x96e   :  { %2985 = vmatprep.subr.bf16.mxu1 %v3302_v1 }
 0xa10   :  { %v1667_v48 = vpop.f32.mrf.mxu1 }
 0xa11   :  { %v1756_v50 = vadd.f32 %v3574_v12, %v1667_v48  ;;  %v3164_v12 = vld [vmem:[#allocation5 + $0x50] sm:$0xff]  }
 0xa12   :  { %v2923_v51 = vpop.f32.mrf.mxu1  ;;  %v3176_v48 = vld [vmem:[%s3689_s8 + $0x30] sm:$0xff]  }
 0xa13   :  { %v1766_v11 = vadd.f32 %v2477_v49, %v1756_v50  ;;  %v3177_v49 = vld [vmem:[%s3689_s8 + $0x28] sm:$0xff]   ;;  %v3178_v50 = vld [vmem:[%s3689_s8 + $0x20] sm:$0xff]   ;;  %v3179_v51 = vld [vmem:[%s3689_s8 + $0x18] sm:$0xff]  }
 0xa14   :  { %v1670_v52 = vpop.f32.mrf.mxu1 }
 0xa15   :  { %v2478_v53 = vmul.f32 -1.442695, %v1766_v11  ;;  %v3181_v52 = vld [vmem:[%s3689_s8 + $0x8] sm:$0xff]  }
 0xa16   :  { %v2924_v54 = vpop.f32.mrf.mxu1 }
 0xa17   :  { %3219 = vpow2.f32 %v2478_v53  ;;  %v3182_v53 = vld [vmem:[%s3689_s8] sm:$0xff]  }
 0xa18   :  { %v2137_v54 = vld [vmem:[%s3688_s7 + $0x2] sm:$0x1]  ;;  %s2346_s7 = sshll.u32 %s3304_s26, 4  ;;  %s2347_s7 = int_to_ptr.vmem [resolvable:$true] %s2346_s7 }
 0xa19   :  { %s3271_s27 = scalar_lea.vmem %s2347_s7, 16  ;;  %s3275_s28 = scalar_lea.vmem %s2347_s7, 32 }
 0xa1a   :  { %p3272_p10 = scmp.ne.s32.totalorder %s2347_s7, %s3271_s27  ;;  %p3276_p11 = scmp.lt.s32.totalorder %s2347_s7, %s2347_s7 }
 0xa1b   :  { %p3277_p12 = scmp.lt.s32.totalorder %s3275_s28, %s3271_s27 }
 0xa1d   :  { %p3278_p13 = por %p3277_p12, %p3276_p11 }
 0xa1f   :  { %p3279_p0 = pnand %p3278_p13, %p3272_p10 }
 0xa24   :  { %v3220_v16 = vpop.eup %3219 }
 0xa25   :  { %v1770_v55 = vadd.f32 1.0, %v3220_v16 }
 0xa27   :  { %3221 = vrcp.f32 %v1770_v55 }
 0xa34   :  { %v3222_v56 = vpop.eup %3221 }
 0xa35   :  { %v1773_v57 = vmul.f32 %v3222_v56, %v1766_v11  ;;  %v3180_v11 = vld [vmem:[%s3689_s8 + $0x10] sm:$0xff]  }
 0xa37   :  { %v1774_v58 = vpack.c.bf16 %v1773_v57, %v1773_v57 }
 0xa39   :  { %2962 = vmatmul.mubr.bf16.vlgmr.msra.gmra.mxu1 %v1774_v58 }
 0xa3a   :  { %3001 = vmatprep.mubr.msk.bf16.mxu1 %vm3303_vm0, %v3302_v1  ;;  %2986 = vmatpush3.bf16.msra.mxu1 %v3159_v7 }
 0xa3b   :  { %2987 = vmatprep.subr.bf16.mxu1 %v3302_v1 }
 0xa3e   :  { %2988 = vmatpush3.bf16.msra.mxu1 %v3160_v8 }
 0xa3f   :  { %2989 = vmatprep.subr.bf16.mxu1 %v3302_v1 }
 0xa42   :  { %2990 = vmatpush3.bf16.msra.mxu1 %v3161_v9 }
 0xa43   :  { %2991 = vmatprep.subr.bf16.mxu1 %v3302_v1 }
 0xa46   :  { %2992 = vmatpush3.bf16.msra.mxu1 %v3162_v62 }
 0xa47   :  { %2993 = vmatprep.subr.bf16.mxu1 %v3302_v1 }
 0xa4a   :  { %2994 = vmatpush3.bf16.msra.mxu1 %v3163_v10 }
 0xa4b   :  { %2995 = vmatprep.subr.bf16.mxu1 %v3302_v1 }
 0xa4e   :  { %2996 = vmatpush3.bf16.msra.mxu1 %v3164_v12 }
 0xa4f   :  { %2997 = vmatprep.subr.bf16.mxu1 %v3302_v1 }
 0xa52   :  { %2998 = vmatpush3.bf16.msra.mxu1 %v3165_v13 }
 0xa53   :  { %2999 = vmatprep.subr.bf16.mxu1 %v3302_v1 }
 0xa56   :  { %3000 = vmatpush3.bf16.msra.mxu1 %v3166_v14 }
 0xa57   :  { %3025 = vmatprep.subr.bf16.mxu1 %v3302_v1 }
 0xaf9   :  { %v1879_v63 = vpop.f32.mrf.mxu1 }
 0xafa   :  { %v1880_v0 = vadd.f32 %v2480_v60, %v1879_v63 }
 0xafb   :  { %v2963_v2 = vpop.f32.mrf.mxu1 }
 0xafc   :  { %v1885_v3 = vpack.c.bf16 %v1880_v0, %v1880_v0 }
 0xafd   :  { %v1882_v4 = vpop.f32.mrf.mxu1 }
 0xafe   :  { %2982 = vmatmul.mubr.bf16.vlgmr.msra.gmra.mxu0 %v1885_v3  ;;  %v2250_v3 = vld [vmem:[%s3690_s9] sm:$0x1] }
 0xaff   :  { %v2964_v6 = vpop.f32.mrf.mxu1  ;;  %3021 = vmatprep.mubr.msk.bf16.mxu0 %vm3303_vm0, %v3302_v1  ;;  %3006 = vmatpush3.bf16.msra.mxu0 %v3167_v15 }
 0xb00   :  { %3007 = vmatprep.subr.bf16.mxu0 %v3302_v1 }
 0xb03   :  { %3008 = vmatpush3.bf16.msra.mxu0 %v3168_v17 }
 0xb04   :  { %3009 = vmatprep.subr.bf16.mxu0 %v3302_v1 }
 0xb07   :  { %3010 = vmatpush3.bf16.msra.mxu0 %v3169_v18 }
 0xb08   :  { %3011 = vmatprep.subr.bf16.mxu0 %v3302_v1 }
 0xb0b   :  { %3012 = vmatpush3.bf16.msra.mxu0 %v3170_v29 }
 0xb0c   :  { %3013 = vmatprep.subr.bf16.mxu0 %v3302_v1 }
 0xb0f   :  { %3014 = vmatpush3.bf16.msra.mxu0 %v3171_v31 }
 0xb10   :  { %3015 = vmatprep.subr.bf16.mxu0 %v3302_v1 }
 0xb13   :  { %3016 = vmatpush3.bf16.msra.mxu0 %v3172_v32 }
 0xb14   :  { %3017 = vmatprep.subr.bf16.mxu0 %v3302_v1 }
 0xb17   :  { %3018 = vmatpush3.bf16.msra.mxu0 %v3173_v33 }
 0xb18   :  { %3019 = vmatprep.subr.bf16.mxu0 %v3302_v1 }
 0xb1b   :  { %3020 = vmatpush3.bf16.msra.mxu0 %v3174_v34 }
 0xbbe   :  { %v1989_v23 = vpop.f32.mrf.mxu0 }
 0xbbf   :  { %v1990_v20 = vadd.f32 %v2489_v19, %v1989_v23 }
 0xbc0   :  { %v2983_v21 = vpop.f32.mrf.mxu0 }
 0xbc1   :  { %v2498_v22 = vmul.f32 -1.442695, %v1990_v20 }
 0xbc2   :  { %v1992_v24 = vpop.f32.mrf.mxu0 }
 0xbc3   :  { %3223 = vpow2.f32 %v2498_v22 }
 0xbc4   :  { %v2984_v25 = vpop.f32.mrf.mxu0 }
 0xbd0   :  { %v3224_v61 = vpop.eup %3223 }
 0xbd1   :  { %v1998_v26 = vadd.f32 1.0, %v3224_v61 }
 0xbd3   :  { %3225 = vrcp.f32 %v1998_v26 }
 0xbe0   :  { %v3226_v27 = vpop.eup %3225 }
 0xbe1   :  { %v2001_v28 = vmul.f32 %v3226_v27, %v1990_v20 }
 0xbe3   :  { %v2002_v30 = vpack.c.bf16 %v2001_v28, %v2001_v28 }
 0xbe5   :  { %3002 = vmatmul.mubr.bf16.vlgmr.msra.gmra.mxu1 %v2002_v30 }
 0xbe6   :  { %3041 = vmatprep.mubr.msk.bf16.mxu1 %vm3303_vm0, %v3302_v1  ;;  %3026 = vmatpush3.bf16.msra.mxu1 %v3175_v47 }
 0xbe7   :  { %3027 = vmatprep.subr.bf16.mxu1 %v3302_v1 }
 0xbea   :  { %3028 = vmatpush3.bf16.msra.mxu1 %v3176_v48 }
 0xbeb   :  { %3029 = vmatprep.subr.bf16.mxu1 %v3302_v1 }
 0xbee   :  { %3030 = vmatpush3.bf16.msra.mxu1 %v3177_v49 }
 0xbef   :  { %3031 = vmatprep.subr.bf16.mxu1 %v3302_v1 }
 0xbf2   :  { %3032 = vmatpush3.bf16.msra.mxu1 %v3178_v50 }
 0xbf3   :  { %3033 = vmatprep.subr.bf16.mxu1 %v3302_v1 }
 0xbf6   :  { %3034 = vmatpush3.bf16.msra.mxu1 %v3179_v51 }
 0xbf7   :  { %3035 = vmatprep.subr.bf16.mxu1 %v3302_v1 }
 0xbfa   :  { %3036 = vmatpush3.bf16.msra.mxu1 %v3180_v11 }
 0xbfb   :  { %3037 = vmatprep.subr.bf16.mxu1 %v3302_v1 }
 0xbfe   :  { %3038 = vmatpush3.bf16.msra.mxu1 %v3181_v52 }
 0xbff   :  { %3039 = vmatprep.subr.bf16.mxu1 %v3302_v1 }
 0xc02   :  { %3040 = vmatpush3.bf16.msra.mxu1 %v3182_v53 }
 0xca5   :  { %v2107_v36 = vpop.f32.mrf.mxu1 }
 0xca6   :  { %v2108_v37 = vadd.f32 %v2499_v35, %v2107_v36 }
 0xca7   :  { %v3003_v38 = vpop.f32.mrf.mxu1 }
 0xca8   :  { %v2113_v39 = vrot.slane %v2108_v37, 4 }
 0xca9   :  { %v2110_v40 = vpop.f32.mrf.mxu1 }
 0xcaa   :  { %v2114_v41 = vadd.f32 %v2113_v39, %v2108_v37 }
 0xcab   :  { %v3004_v42 = vpop.f32.mrf.mxu1 }
 0xcac   :  { %v2115_v43 = vrot.slane %v2114_v41, 2 }
 0xcae   :  { %v2116_v44 = vadd.f32 %v2115_v43, %v2114_v41 }
 0xcb0   :  { %v2117_v5 = vrot.slane %v2116_v44, 1 }
 0xcb2   :  { %v2118_v45 = vadd.f32 %v2117_v5, %v2116_v44 }
 0xcb4   :  { %v2119_v46 = vpack.c.bf16 %v2118_v45, %v2118_v45 }
 0xcb6   :  { %3022 = vmatmul.mubr.bf16.vlgmr.msra.gmra.mxu0 %v2119_v46 }
 0xd76   :  { %v2220_v16 = vpop.f32.mrf.mxu0 }
 0xd77   :  { %v2221_v55 = vadd.f32 %v2220_v16, %v2137_v54 }
 0xd78   :  { %v3023_v56 = vpop.f32.mrf.mxu0 }
 0xd79   :  { %v2516_v57 = vmul.f32 -1.442695, %v2221_v55 }
 0xd7a   :  { %v2223_v58 = vpop.f32.mrf.mxu0 }
 0xd7b   :  { %3227 = vpow2.f32 %v2516_v57 }
 0xd7c   :  { %v3024_v59 = vpop.f32.mrf.mxu0 }
 0xd88   :  { %v3228_v60 = vpop.eup %3227 }
 0xd89   :  { %v2229_v63 = vadd.f32 1.0, %v3228_v60 }
 0xd8b   :  { %3229 = vrcp.f32 %v2229_v63 }
 0xd98   :  { %v3230_v1 = vpop.eup %3229 }
 0xd99   :  { %v2232_v0 = vmul.f32 %v3230_v1, %v2221_v55 }
 0xd9b   :  { %v2233_v2 = vpack.c.bf16 %v2232_v0, %v2232_v0 }
 0xd9d   :  { %3042 = vmatmul.mubr.bf16.vlgmr.msra.gmra.mxu1 %v2233_v2 }
 0xe5d   :  { %v2333_v4 = vpop.f32.mrf.mxu1 }
 0xe5e   :  { %v2334_v6 = vadd.f32 %v2333_v4, %v2250_v3 }
 0xe5f   :  { %v3043_v7 = vpop.f32.mrf.mxu1 }
 0xe60   :  { %2339 = vst [vmem:[#allocation7] sm:$0x1] %v2334_v6 }
 0xe61   :  { %v2336_v8 = vpop.f32.mrf.mxu1 }
 0xe62   :  { %3282 = shalt.err (!%p3279_p0)
}
 0xe63   :  { %2349 = dma.vmem_to_hbm [thread:$0]  %s2347_s7, 16, %s3691_s10, [#allocation4]   ;;  %v3044_v9 = vpop.f32.mrf.mxu1 }
 0xe64   :  { %3295 = dma.done.wait [#allocation4], 16  }
 0xe65   :  { %3296 = vsyncadd [#allocation4], 4294967280 }
 0xe66   :  { %2353 = vsyncpa [#allocation3], 1 }
 0xe67   :  { %2354 = vsyncpa [#allocation6], 1 }
 0xe68   :  { %2355 = vsyncpa [#allocation4], 1 }

</bundles_post_ra>
